<compile_context>
chip_gen: v7x
topology: tpu7x:2x2x1
jax: 0.10.0
libtpu: 0.0.40
codegen_flags: <defaults>
</compile_context>

<pallas_src>
import functools

import jax
import jax.numpy as jnp
from jax import lax
from jax.experimental import pallas as pl
from jax.experimental.pallas import tpu as pltpu


# ----------------------------------------------------------------------------
# Pallas kernel: tiled GEMM + bias + (optional) LeakyReLU epilogue
# ----------------------------------------------------------------------------
def _dense_kernel(a_ref, w_ref, b_ref, o_ref, *, leaky, apply_act):
    k = pl.program_id(2)

    @pl.when(k == 0)
    def _():
        o_ref[...] = jnp.zeros_like(o_ref)

    # Accumulate directly into the resident f32 output block.
    o_ref[...] += jnp.dot(a_ref[...], w_ref[...],
                          preferred_element_type=jnp.float32)

    @pl.when(k == pl.num_programs(2) - 1)
    def _():
        y = o_ref[...] + b_ref[...]            # bias broadcasts over rows
        if apply_act:
            y = jnp.where(y >= 0, y, leaky * y)  # LeakyReLU
        o_ref[...] = y


def _round_up(x, m):
    return (x + m - 1) // m * m


def _pallas_dense(a, w2, bias, *, leaky, apply_act,
                  tm_max=256, tn_max=256):
    """a: (M, K) f32, w2: (K, N) f32, bias: (1, N) f32 -> (M, N) f32."""
    M, K = a.shape
    K2, N = w2.shape
    assert K == K2 and bias.shape == (1, N)

    # N tile: full if small, else 256 (matches 256-wide MXU on v6e/v7x).
    if N <= tn_max:
        tn = N
    else:
        tn = next((c for c in (tn_max, 128) if N % c == 0), N)

    # K tile: full-extent single step for small/medium K (160, 640, ...);
    # 512 for the big layers (2560, 5120).
    if K <= 1024:
        tk = K
    else:
        tk = next((c for c in (512, 256, 128) if K % c == 0), K)

    # M tile: 256 (pad M up to a tile multiple); smaller M -> single block.
    if M >= tm_max:
        tm = tm_max
        M_pad = _round_up(M, tm)
    else:
        tm = _round_up(max(M, 8), 8)
        M_pad = tm
    if M_pad != M:
        a = jnp.pad(a, ((0, M_pad - M), (0, 0)))

    grid = (M_pad // tm, N // tn, K // tk)

    out = pl.pallas_call(
        functools.partial(_dense_kernel, leaky=leaky, apply_act=apply_act),
        out_shape=jax.ShapeDtypeStruct((M_pad, N), jnp.float32),
        grid=grid,
        in_specs=[
            pl.BlockSpec((tm, tk), lambda i, j, k: (i, k)),
            pl.BlockSpec((tk, tn), lambda i, j, k: (k, j)),
            pl.BlockSpec((1, tn), lambda i, j, k: (0, j)),
        ],
        out_specs=pl.BlockSpec((tm, tn), lambda i, j, k: (i, j)),
        compiler_params=pltpu.CompilerParams(
            dimension_semantics=("parallel", "parallel", "arbitrary"),
            vmem_limit_bytes=32 * 1024 * 1024),
    )(a, w2, bias)

    if M_pad != M:
        out = out[:M]
    return out


def dense_bias_act(a, w2, bias, *, leaky, apply_act):
    """Dispatch: MXU Pallas GEMM for real layers, plain XLA dot for tiny ones
    (K=Cin*KH=5 first layer, Cout=1 final conv) which are memory-bound."""
    _, K = a.shape
    N = w2.shape[1]
    if K >= 128 and N >= 128:
        return _pallas_dense(a, w2, bias, leaky=leaky, apply_act=apply_act)
    y = jnp.dot(a, w2, preferred_element_type=jnp.float32) + bias
    if apply_act:
        y = jnp.where(y >= 0, y, leaky * y)
    return y


# ----------------------------------------------------------------------------
# Conv2d with kernel (KH, 1), channels-last, lowered to GEMM
# ----------------------------------------------------------------------------
def conv2d_cl(x, w2, bias, *, kh, stride_h, pad_h, leaky, apply_act):
    """x: (B, H, W, Cin) channels-last; w2: (KH*Cin, Cout); bias: (1, Cout)."""
    B, H, W, Cin = x.shape
    Cout = w2.shape[1]

    xp = jnp.pad(x, ((0, 0), (pad_h, pad_h), (0, 0), (0, 0)))
    H_out = (H + 2 * pad_h - kh) // stride_h + 1

    # Strided channels-last gather of the KH taps; stacking on axis=3 makes the
    # reshape to (M, KH*Cin) contiguous -> no transposes materialized.
    taps = [xp[:, k:k + stride_h * (H_out - 1) + 1:stride_h] for k in range(kh)]
    a = jnp.stack(taps, axis=3).reshape(B * H_out * W, kh * Cin)

    y = dense_bias_act(a, w2, bias, leaky=leaky, apply_act=apply_act)
    return y.reshape(B, H_out, W, Cout)


# ----------------------------------------------------------------------------
# Parameters
# ----------------------------------------------------------------------------
IN_CH = [1, 32, 128, 512, 1024]
OUT_CH = IN_CH[1:] + [1024]


def init_pd_params(key):
    """Raw OIHW weights (as PyTorch stores them) + biases."""
    params = []
    for i in range(5):
        key, kw, kb = jax.random.split(key, 3)
        cin, cout, kh = IN_CH[i], OUT_CH[i], 5
        std = 1.0 / jnp.sqrt(cin * kh)
        w = jax.random.normal(kw, (cout, cin, kh, 1), jnp.float32) * std
        b = jax.random.normal(kb, (cout,), jnp.float32) * 0.01
        params.append((w, b))
    key, kw, kb = jax.random.split(key, 3)
    std = 1.0 / jnp.sqrt(1024 * 3)
    w = jax.random.normal(kw, (1, 1024, 3, 1), jnp.float32) * std
    b = jax.random.normal(kb, (1,), jnp.float32) * 0.01
    params.append((w, b))
    return params


def pack_params(raw_params):
    """One-time packing: OIHW (Cout, Cin, KH, 1) -> GEMM weight (KH*Cin, Cout),
    column order (kh, ci) to match the channels-last im2col, bias -> (1, Cout)."""
    packed = []
    for w, b in raw_params:
        cout, cin, kh, _ = w.shape
        w2 = jnp.transpose(w[..., 0], (2, 1, 0)).reshape(kh * cin, cout)
        packed.append((w2, b.reshape(1, cout)))
    return packed


# ----------------------------------------------------------------------------
# PD forward pass
# ----------------------------------------------------------------------------
def pd_forward(x, packed, *, period, leaky=0.1):
    """x: (B, C=1, T) -> (flattened_out, list_of_NCHW_feature_maps)."""
    B, C, T = x.shape
    pad = (-T) % period
    if pad != 0:
        x = jnp.pad(x, ((0, 0), (0, 0), (0, pad)), mode="reflect")
    H = x.shape[-1] // period
    # (B, C, H, W) -> channels-last (B, H, W, C); free for C == 1.
    x = jnp.transpose(x.reshape(B, C, H, period), (0, 2, 3, 1))

    res = []
    for i in range(5):
        w2, b = packed[i]
        x = conv2d_cl(x, w2, b, kh=5, stride_h=3, pad_h=2,
                      leaky=leaky, apply_act=True)
        res.append(jnp.transpose(x, (0, 3, 1, 2)))   # NCHW, matches PyTorch

    w2, b = packed[5]
    x = conv2d_cl(x, w2, b, kh=3, stride_h=1, pad_h=1,
                  leaky=leaky, apply_act=False)
    res.append(jnp.transpose(x, (0, 3, 1, 2)))

    out = res[-1].reshape(B, -1)                     # == torch.flatten(x, 1, -1)
    return out, res


# ----------------------------------------------------------------------------
# Plain-JAX NCHW reference (for correctness check)
# ----------------------------------------------------------------------------
def _ref_conv(x, w, b, stride_h, pad_h, leaky, apply_act):
    y = lax.conv_general_dilated(
        x, w, window_strides=(stride_h, 1),
        padding=((pad_h, pad_h), (0, 0)),
        dimension_numbers=("NCHW", "OIHW", "NCHW"))
    y = y + b[None, :, None, None]
    if apply_act:
        y = jnp.where(y >= 0, y, leaky * y)
    return y


def pd_forward_ref(x, raw_params, *, period, leaky=0.1):
    B, C, T = x.shape
    pad = (-T) % period
    if pad != 0:
        x = jnp.pad(x, ((0, 0), (0, 0), (0, pad)), mode="reflect")
    x = x.reshape(B, C, -1, period)
    res = []
    for i in range(5):
        w, b = raw_params[i]
        x = _ref_conv(x, w, b, 3, 2, leaky, True)
        res.append(x)
    w, b = raw_params[5]
    x = _ref_conv(x, w, b, 1, 1, leaky, False)
    res.append(x)
    return x.reshape(B, -1), res


if __name__ == "__main__":
    key = jax.random.PRNGKey(0)
    key, kx, kp = jax.random.split(key, 3)

    period = 4
    B, C, T = 2, 1, 199            # T not divisible by period -> reflect pad
    x = jax.random.normal(kx, (B, C, T), jnp.float32)

    raw_params = init_pd_params(kp)
    packed = pack_params(raw_params)

    fwd = jax.jit(functools.partial(pd_forward, period=period, leaky=0.1))
    out, res = fwd(x, packed)
    out = jax.block_until_ready(out)
    for r in res:
        jax.block_until_ready(r)

    ref_out, ref_res = pd_forward_ref(x, raw_params, period=period, leaky=0.1)
    ref_out = jax.block_until_ready(ref_out)

    assert out.shape == ref_out.shape, (out.shape, ref_out.shape)
    assert jnp.allclose(out, ref_out, atol=2e-3, rtol=2e-3), (
        f"max err {jnp.max(jnp.abs(out - ref_out))}")
    for r, rr in zip(res, ref_res):
        assert r.shape == rr.shape, (r.shape, rr.shape)
        assert jnp.allclose(r, rr, atol=2e-3, rtol=2e-3), (
            f"max err {jnp.max(jnp.abs(r - rr))}")

    print("KERNEL_OK")
</pallas_src>

<mosaic_0001>
module attributes {stable_mosaic.version = 11 : i64} {
  func.func @_dense_kernel(%arg0: i32, %arg1: i32, %arg2: i32, %arg3: memref<48x160xf32, #tpu.memory_space<vmem>>, %arg4: memref<160x128xf32, #tpu.memory_space<vmem>>, %arg5: memref<1x128xf32, #tpu.memory_space<vmem>>, %arg6: memref<48x128xf32, #tpu.memory_space<vmem>>) attributes {dimension_semantics = [#tpu.dimension_semantics<parallel>, #tpu.dimension_semantics<parallel>, #tpu.dimension_semantics<arbitrary>], iteration_bounds = array<i64: 1, 1, 1>, scalar_prefetch = 0 : i64, scratch_operands = 0 : i64, tpu.core_type = #tpu.core_type<tc>, window_params = [{transform_indices = @transform_0, window_bounds = array<i64: 48, 160>}, {transform_indices = @transform_1, window_bounds = array<i64: 160, 128>}, {transform_indices = @transform_2, window_bounds = array<i64: 1, 128>}, {transform_indices = @transform_3, window_bounds = array<i64: 48, 128>}]} {
    %c0_i32 = arith.constant 0 : i32
    %0 = arith.cmpi eq, %arg2, %c0_i32 : i32
    %1 = arith.extui %0 : i1 to i32
    %c0_i32_0 = arith.constant 0 : i32
    %2 = arith.cmpi ne, %1, %c0_i32_0 : i32
    scf.if %2 {
      %cst_10 = arith.constant 0.000000e+00 : f32
      %12 = vector.broadcast %cst_10 : f32 to vector<48x128xf32>
      %c0_11 = arith.constant 0 : index
      %c0_12 = arith.constant 0 : index
      %13 = vector.load %arg6[%c0_11, %c0_12] : memref<48x128xf32, #tpu.memory_space<vmem>>, vector<48x128xf32>
      tpu.vector_store %arg6[%c0_11, %c0_12], %12 {strides = array<i32>} : memref<48x128xf32, #tpu.memory_space<vmem>>, vector<48x128xf32>,
    } else {
    }
    %c0 = arith.constant 0 : index
    %c0_1 = arith.constant 0 : index
    %3 = vector.load %arg6[%c0, %c0_1] : memref<48x128xf32, #tpu.memory_space<vmem>>, vector<48x128xf32>
    %c0_2 = arith.constant 0 : index
    %c0_3 = arith.constant 0 : index
    %4 = vector.load %arg3[%c0_2, %c0_3] : memref<48x160xf32, #tpu.memory_space<vmem>>, vector<48x160xf32>
    %c0_4 = arith.constant 0 : index
    %c0_5 = arith.constant 0 : index
    %5 = vector.load %arg4[%c0_4, %c0_5] : memref<160x128xf32, #tpu.memory_space<vmem>>, vector<160x128xf32>
    %cst = arith.constant dense<0.000000e+00> : vector<48x128xf32>
    %6 = tpu.matmul %4, %5, %cst {dimension_numbers = #tpu.dot_dimension_numbers<[1], [0], [0], [1], [0, 0, 1, 1], [], []>} : vector<48x160xf32>, vector<160x128xf32>, vector<48x128xf32> -> vector<48x128xf32>
    %7 = arith.addf %3, %6 : vector<48x128xf32>
    %c0_6 = arith.constant 0 : index
    %c0_7 = arith.constant 0 : index
    %8 = vector.load %arg6[%c0_6, %c0_7] : memref<48x128xf32, #tpu.memory_space<vmem>>, vector<48x128xf32>
    tpu.vector_store %arg6[%c0_6, %c0_7], %7 {strides = array<i32>} : memref<48x128xf32, #tpu.memory_space<vmem>>, vector<48x128xf32>,
    %c0_i32_8 = arith.constant 0 : i32
    %9 = arith.cmpi eq, %arg2, %c0_i32_8 : i32
    %10 = arith.extui %9 : i1 to i32
    %c0_i32_9 = arith.constant 0 : i32
    %11 = arith.cmpi ne, %10, %c0_i32_9 : i32
    scf.if %11 {
      %c0_10 = arith.constant 0 : index
      %c0_11 = arith.constant 0 : index
      %12 = vector.load %arg6[%c0_10, %c0_11] : memref<48x128xf32, #tpu.memory_space<vmem>>, vector<48x128xf32>
      %c0_12 = arith.constant 0 : index
      %c0_13 = arith.constant 0 : index
      %13 = vector.load %arg5[%c0_12, %c0_13] : memref<1x128xf32, #tpu.memory_space<vmem>>, vector<1x128xf32>
      %14 = vector.broadcast %13 : vector<1x128xf32> to vector<48x128xf32>
      %15 = arith.addf %12, %14 : vector<48x128xf32>
      %cst_14 = arith.constant 0.000000e+00 : f32
      %16 = vector.broadcast %cst_14 : f32 to vector<48x128xf32>
      %17 = arith.cmpf oge, %15, %16 : vector<48x128xf32>
      %cst_15 = arith.constant 1.000000e-01 : f32
      %18 = vector.broadcast %cst_15 : f32 to vector<48x128xf32>
      %19 = arith.mulf %18, %15 : vector<48x128xf32>
      %20 = arith.select %17, %15, %19 : vector<48x128xi1>, vector<48x128xf32>
      %c0_16 = arith.constant 0 : index
      %c0_17 = arith.constant 0 : index
      %21 = vector.load %arg6[%c0_16, %c0_17] : memref<48x128xf32, #tpu.memory_space<vmem>>, vector<48x128xf32>
      tpu.vector_store %arg6[%c0_16, %c0_17], %20 {strides = array<i32>} : memref<48x128xf32, #tpu.memory_space<vmem>>, vector<48x128xf32>,
    } else {
    }
    return
  }
  func.func @transform_0(%arg0: i32, %arg1: i32, %arg2: i32) -> (i32, i32) {
    %c0_i32 = arith.constant 0 : i32
    return %arg0, %arg2 : i32, i32
  }
  func.func @transform_1(%arg0: i32, %arg1: i32, %arg2: i32) -> (i32, i32) {
    %c0_i32 = arith.constant 0 : i32
    return %arg2, %arg1 : i32, i32
  }
  func.func @transform_2(%arg0: i32, %arg1: i32, %arg2: i32) -> (i32, i32) {
    %c0_i32 = arith.constant 0 : i32
    %c0_i32_0 = arith.constant 0 : i32
    return %c0_i32, %arg1 : i32, i32
  }
  func.func @transform_3(%arg0: i32, %arg1: i32, %arg2: i32) -> (i32, i32) {
    %c0_i32 = arith.constant 0 : i32
    return %arg0, %arg1 : i32, i32
  }
}

module attributes {stable_mosaic.version = 11 : i64} {
  func.func @_dense_kernel(%arg0: i32, %arg1: i32, %arg2: i32, %arg3: memref<16x640xf32, #tpu.memory_space<vmem>>, %arg4: memref<640x256xf32, #tpu.memory_space<vmem>>, %arg5: memref<1x256xf32, #tpu.memory_space<vmem>>, %arg6: memref<16x256xf32, #tpu.memory_space<vmem>>) attributes {dimension_semantics = [#tpu.dimension_semantics<parallel>, #tpu.dimension_semantics<parallel>, #tpu.dimension_semantics<arbitrary>], iteration_bounds = array<i64: 1, 2, 1>, scalar_prefetch = 0 : i64, scratch_operands = 0 : i64, tpu.core_type = #tpu.core_type<tc>, window_params = [{transform_indices = @transform_0, window_bounds = array<i64: 16, 640>}, {transform_indices = @transform_1, window_bounds = array<i64: 640, 256>}, {transform_indices = @transform_2, window_bounds = array<i64: 1, 256>}, {transform_indices = @transform_3, window_bounds = array<i64: 16, 256>}]} {
    %c0_i32 = arith.constant 0 : i32
    %0 = arith.cmpi eq, %arg2, %c0_i32 : i32
    %1 = arith.extui %0 : i1 to i32
    %c0_i32_0 = arith.constant 0 : i32
    %2 = arith.cmpi ne, %1, %c0_i32_0 : i32
    scf.if %2 {
      %cst_10 = arith.constant 0.000000e+00 : f32
      %12 = vector.broadcast %cst_10 : f32 to vector<16x256xf32>
      %c0_11 = arith.constant 0 : index
      %c0_12 = arith.constant 0 : index
      %13 = vector.load %arg6[%c0_11, %c0_12] : memref<16x256xf32, #tpu.memory_space<vmem>>, vector<16x256xf32>
      tpu.vector_store %arg6[%c0_11, %c0_12], %12 {strides = array<i32>} : memref<16x256xf32, #tpu.memory_space<vmem>>, vector<16x256xf32>,
    } else {
    }
    %c0 = arith.constant 0 : index
    %c0_1 = arith.constant 0 : index
    %3 = vector.load %arg6[%c0, %c0_1] : memref<16x256xf32, #tpu.memory_space<vmem>>, vector<16x256xf32>
    %c0_2 = arith.constant 0 : index
    %c0_3 = arith.constant 0 : index
    %4 = vector.load %arg3[%c0_2, %c0_3] : memref<16x640xf32, #tpu.memory_space<vmem>>, vector<16x640xf32>
    %c0_4 = arith.constant 0 : index
    %c0_5 = arith.constant 0 : index
    %5 = vector.load %arg4[%c0_4, %c0_5] : memref<640x256xf32, #tpu.memory_space<vmem>>, vector<640x256xf32>
    %cst = arith.constant dense<0.000000e+00> : vector<16x256xf32>
    %6 = tpu.matmul %4, %5, %cst {dimension_numbers = #tpu.dot_dimension_numbers<[1], [0], [0], [1], [0, 0, 1, 1], [], []>} : vector<16x640xf32>, vector<640x256xf32>, vector<16x256xf32> -> vector<16x256xf32>
    %7 = arith.addf %3, %6 : vector<16x256xf32>
    %c0_6 = arith.constant 0 : index
    %c0_7 = arith.constant 0 : index
    %8 = vector.load %arg6[%c0_6, %c0_7] : memref<16x256xf32, #tpu.memory_space<vmem>>, vector<16x256xf32>
    tpu.vector_store %arg6[%c0_6, %c0_7], %7 {strides = array<i32>} : memref<16x256xf32, #tpu.memory_space<vmem>>, vector<16x256xf32>,
    %c0_i32_8 = arith.constant 0 : i32
    %9 = arith.cmpi eq, %arg2, %c0_i32_8 : i32
    %10 = arith.extui %9 : i1 to i32
    %c0_i32_9 = arith.constant 0 : i32
    %11 = arith.cmpi ne, %10, %c0_i32_9 : i32
    scf.if %11 {
      %c0_10 = arith.constant 0 : index
      %c0_11 = arith.constant 0 : index
      %12 = vector.load %arg6[%c0_10, %c0_11] : memref<16x256xf32, #tpu.memory_space<vmem>>, vector<16x256xf32>
      %c0_12 = arith.constant 0 : index
      %c0_13 = arith.constant 0 : index
      %13 = vector.load %arg5[%c0_12, %c0_13] : memref<1x256xf32, #tpu.memory_space<vmem>>, vector<1x256xf32>
      %14 = vector.broadcast %13 : vector<1x256xf32> to vector<16x256xf32>
      %15 = arith.addf %12, %14 : vector<16x256xf32>
      %cst_14 = arith.constant 0.000000e+00 : f32
      %16 = vector.broadcast %cst_14 : f32 to vector<16x256xf32>
      %17 = arith.cmpf oge, %15, %16 : vector<16x256xf32>
      %cst_15 = arith.constant 1.000000e-01 : f32
      %18 = vector.broadcast %cst_15 : f32 to vector<16x256xf32>
      %19 = arith.mulf %18, %15 : vector<16x256xf32>
      %20 = arith.select %17, %15, %19 : vector<16x256xi1>, vector<16x256xf32>
      %c0_16 = arith.constant 0 : index
      %c0_17 = arith.constant 0 : index
      %21 = vector.load %arg6[%c0_16, %c0_17] : memref<16x256xf32, #tpu.memory_space<vmem>>, vector<16x256xf32>
      tpu.vector_store %arg6[%c0_16, %c0_17], %20 {strides = array<i32>} : memref<16x256xf32, #tpu.memory_space<vmem>>, vector<16x256xf32>,
    } else {
    }
    return
  }
  func.func @transform_0(%arg0: i32, %arg1: i32, %arg2: i32) -> (i32, i32) {
    %c0_i32 = arith.constant 0 : i32
    return %arg0, %arg2 : i32, i32
  }
  func.func @transform_1(%arg0: i32, %arg1: i32, %arg2: i32) -> (i32, i32) {
    %c0_i32 = arith.constant 0 : i32
    return %arg2, %arg1 : i32, i32
  }
  func.func @transform_2(%arg0: i32, %arg1: i32, %arg2: i32) -> (i32, i32) {
    %c0_i32 = arith.constant 0 : i32
    %c0_i32_0 = arith.constant 0 : i32
    return %c0_i32, %arg1 : i32, i32
  }
  func.func @transform_3(%arg0: i32, %arg1: i32, %arg2: i32) -> (i32, i32) {
    %c0_i32 = arith.constant 0 : i32
    return %arg0, %arg1 : i32, i32
  }
}

module attributes {stable_mosaic.version = 11 : i64} {
  func.func @_dense_kernel(%arg0: i32, %arg1: i32, %arg2: i32, %arg3: memref<8x512xf32, #tpu.memory_space<vmem>>, %arg4: memref<512x256xf32, #tpu.memory_space<vmem>>, %arg5: memref<1x256xf32, #tpu.memory_space<vmem>>, %arg6: memref<8x256xf32, #tpu.memory_space<vmem>>) attributes {dimension_semantics = [#tpu.dimension_semantics<parallel>, #tpu.dimension_semantics<parallel>, #tpu.dimension_semantics<arbitrary>], iteration_bounds = array<i64: 1, 4, 5>, scalar_prefetch = 0 : i64, scratch_operands = 0 : i64, tpu.core_type = #tpu.core_type<tc>, window_params = [{transform_indices = @transform_0, window_bounds = array<i64: 8, 512>}, {transform_indices = @transform_1, window_bounds = array<i64: 512, 256>}, {transform_indices = @transform_2, window_bounds = array<i64: 1, 256>}, {transform_indices = @transform_3, window_bounds = array<i64: 8, 256>}]} {
    %c0_i32 = arith.constant 0 : i32
    %0 = arith.cmpi eq, %arg2, %c0_i32 : i32
    %1 = arith.extui %0 : i1 to i32
    %c0_i32_0 = arith.constant 0 : i32
    %2 = arith.cmpi ne, %1, %c0_i32_0 : i32
    scf.if %2 {
      %cst_9 = arith.constant 0.000000e+00 : f32
      %12 = vector.broadcast %cst_9 : f32 to vector<8x256xf32>
      %c0_10 = arith.constant 0 : index
      %c0_11 = arith.constant 0 : index
      %13 = vector.load %arg6[%c0_10, %c0_11] : memref<8x256xf32, #tpu.memory_space<vmem>>, vector<8x256xf32>
      tpu.vector_store %arg6[%c0_10, %c0_11], %12 {strides = array<i32>} : memref<8x256xf32, #tpu.memory_space<vmem>>, vector<8x256xf32>,
    } else {
    }
    %c0 = arith.constant 0 : index
    %c0_1 = arith.constant 0 : index
    %3 = vector.load %arg6[%c0, %c0_1] : memref<8x256xf32, #tpu.memory_space<vmem>>, vector<8x256xf32>
    %c0_2 = arith.constant 0 : index
    %c0_3 = arith.constant 0 : index
    %4 = vector.load %arg3[%c0_2, %c0_3] : memref<8x512xf32, #tpu.memory_space<vmem>>, vector<8x512xf32>
    %c0_4 = arith.constant 0 : index
    %c0_5 = arith.constant 0 : index
    %5 = vector.load %arg4[%c0_4, %c0_5] : memref<512x256xf32, #tpu.memory_space<vmem>>, vector<512x256xf32>
    %cst = arith.constant dense<0.000000e+00> : vector<8x256xf32>
    %6 = tpu.matmul %4, %5, %cst {dimension_numbers = #tpu.dot_dimension_numbers<[1], [0], [0], [1], [0, 0, 1, 1], [], []>} : vector<8x512xf32>, vector<512x256xf32>, vector<8x256xf32> -> vector<8x256xf32>
    %7 = arith.addf %3, %6 : vector<8x256xf32>
    %c0_6 = arith.constant 0 : index
    %c0_7 = arith.constant 0 : index
    %8 = vector.load %arg6[%c0_6, %c0_7] : memref<8x256xf32, #tpu.memory_space<vmem>>, vector<8x256xf32>
    tpu.vector_store %arg6[%c0_6, %c0_7], %7 {strides = array<i32>} : memref<8x256xf32, #tpu.memory_space<vmem>>, vector<8x256xf32>,
    %c4_i32 = arith.constant 4 : i32
    %9 = arith.cmpi eq, %arg2, %c4_i32 : i32
    %10 = arith.extui %9 : i1 to i32
    %c0_i32_8 = arith.constant 0 : i32
    %11 = arith.cmpi ne, %10, %c0_i32_8 : i32
    scf.if %11 {
      %c0_9 = arith.constant 0 : index
      %c0_10 = arith.constant 0 : index
      %12 = vector.load %arg6[%c0_9, %c0_10] : memref<8x256xf32, #tpu.memory_space<vmem>>, vector<8x256xf32>
      %c0_11 = arith.constant 0 : index
      %c0_12 = arith.constant 0 : index
      %13 = vector.load %arg5[%c0_11, %c0_12] : memref<1x256xf32, #tpu.memory_space<vmem>>, vector<1x256xf32>
      %14 = vector.broadcast %13 : vector<1x256xf32> to vector<8x256xf32>
      %15 = arith.addf %12, %14 : vector<8x256xf32>
      %cst_13 = arith.constant 0.000000e+00 : f32
      %16 = vector.broadcast %cst_13 : f32 to vector<8x256xf32>
      %17 = arith.cmpf oge, %15, %16 : vector<8x256xf32>
      %cst_14 = arith.constant 1.000000e-01 : f32
      %18 = vector.broadcast %cst_14 : f32 to vector<8x256xf32>
      %19 = arith.mulf %18, %15 : vector<8x256xf32>
      %20 = arith.select %17, %15, %19 : vector<8x256xi1>, vector<8x256xf32>
      %c0_15 = arith.constant 0 : index
      %c0_16 = arith.constant 0 : index
      %21 = vector.load %arg6[%c0_15, %c0_16] : memref<8x256xf32, #tpu.memory_space<vmem>>, vector<8x256xf32>
      tpu.vector_store %arg6[%c0_15, %c0_16], %20 {strides = array<i32>} : memref<8x256xf32, #tpu.memory_space<vmem>>, vector<8x256xf32>,
    } else {
    }
    return
  }
  func.func @transform_0(%arg0: i32, %arg1: i32, %arg2: i32) -> (i32, i32) {
    %c0_i32 = arith.constant 0 : i32
    return %arg0, %arg2 : i32, i32
  }
  func.func @transform_1(%arg0: i32, %arg1: i32, %arg2: i32) -> (i32, i32) {
    %c0_i32 = arith.constant 0 : i32
    return %arg2, %arg1 : i32, i32
  }
  func.func @transform_2(%arg0: i32, %arg1: i32, %arg2: i32) -> (i32, i32) {
    %c0_i32 = arith.constant 0 : i32
    %c0_i32_0 = arith.constant 0 : i32
    return %c0_i32, %arg1 : i32, i32
  }
  func.func @transform_3(%arg0: i32, %arg1: i32, %arg2: i32) -> (i32, i32) {
    %c0_i32 = arith.constant 0 : i32
    return %arg0, %arg1 : i32, i32
  }
}

module attributes {stable_mosaic.version = 11 : i64} {
  func.func @_dense_kernel(%arg0: i32, %arg1: i32, %arg2: i32, %arg3: memref<8x512xf32, #tpu.memory_space<vmem>>, %arg4: memref<512x256xf32, #tpu.memory_space<vmem>>, %arg5: memref<1x256xf32, #tpu.memory_space<vmem>>, %arg6: memref<8x256xf32, #tpu.memory_space<vmem>>) attributes {dimension_semantics = [#tpu.dimension_semantics<parallel>, #tpu.dimension_semantics<parallel>, #tpu.dimension_semantics<arbitrary>], iteration_bounds = array<i64: 1, 4, 10>, scalar_prefetch = 0 : i64, scratch_operands = 0 : i64, tpu.core_type = #tpu.core_type<tc>, window_params = [{transform_indices = @transform_0, window_bounds = array<i64: 8, 512>}, {transform_indices = @transform_1, window_bounds = array<i64: 512, 256>}, {transform_indices = @transform_2, window_bounds = array<i64: 1, 256>}, {transform_indices = @transform_3, window_bounds = array<i64: 8, 256>}]} {
    %c0_i32 = arith.constant 0 : i32
    %0 = arith.cmpi eq, %arg2, %c0_i32 : i32
    %1 = arith.extui %0 : i1 to i32
    %c0_i32_0 = arith.constant 0 : i32
    %2 = arith.cmpi ne, %1, %c0_i32_0 : i32
    scf.if %2 {
      %cst_9 = arith.constant 0.000000e+00 : f32
      %12 = vector.broadcast %cst_9 : f32 to vector<8x256xf32>
      %c0_10 = arith.constant 0 : index
      %c0_11 = arith.constant 0 : index
      %13 = vector.load %arg6[%c0_10, %c0_11] : memref<8x256xf32, #tpu.memory_space<vmem>>, vector<8x256xf32>
      tpu.vector_store %arg6[%c0_10, %c0_11], %12 {strides = array<i32>} : memref<8x256xf32, #tpu.memory_space<vmem>>, vector<8x256xf32>,
    } else {
    }
    %c0 = arith.constant 0 : index
    %c0_1 = arith.constant 0 : index
    %3 = vector.load %arg6[%c0, %c0_1] : memref<8x256xf32, #tpu.memory_space<vmem>>, vector<8x256xf32>
    %c0_2 = arith.constant 0 : index
    %c0_3 = arith.constant 0 : index
    %4 = vector.load %arg3[%c0_2, %c0_3] : memref<8x512xf32, #tpu.memory_space<vmem>>, vector<8x512xf32>
    %c0_4 = arith.constant 0 : index
    %c0_5 = arith.constant 0 : index
    %5 = vector.load %arg4[%c0_4, %c0_5] : memref<512x256xf32, #tpu.memory_space<vmem>>, vector<512x256xf32>
    %cst = arith.constant dense<0.000000e+00> : vector<8x256xf32>
    %6 = tpu.matmul %4, %5, %cst {dimension_numbers = #tpu.dot_dimension_numbers<[1], [0], [0], [1], [0, 0, 1, 1], [], []>} : vector<8x512xf32>, vector<512x256xf32>, vector<8x256xf32> -> vector<8x256xf32>
    %7 = arith.addf %3, %6 : vector<8x256xf32>
    %c0_6 = arith.constant 0 : index
    %c0_7 = arith.constant 0 : index
    %8 = vector.load %arg6[%c0_6, %c0_7] : memref<8x256xf32, #tpu.memory_space<vmem>>, vector<8x256xf32>
    tpu.vector_store %arg6[%c0_6, %c0_7], %7 {strides = array<i32>} : memref<8x256xf32, #tpu.memory_space<vmem>>, vector<8x256xf32>,
    %c9_i32 = arith.constant 9 : i32
    %9 = arith.cmpi eq, %arg2, %c9_i32 : i32
    %10 = arith.extui %9 : i1 to i32
    %c0_i32_8 = arith.constant 0 : i32
    %11 = arith.cmpi ne, %10, %c0_i32_8 : i32
    scf.if %11 {
      %c0_9 = arith.constant 0 : index
      %c0_10 = arith.constant 0 : index
      %12 = vector.load %arg6[%c0_9, %c0_10] : memref<8x256xf32, #tpu.memory_space<vmem>>, vector<8x256xf32>
      %c0_11 = arith.constant 0 : index
      %c0_12 = arith.constant 0 : index
      %13 = vector.load %arg5[%c0_11, %c0_12] : memref<1x256xf32, #tpu.memory_space<vmem>>, vector<1x256xf32>
      %14 = vector.broadcast %13 : vector<1x256xf32> to vector<8x256xf32>
      %15 = arith.addf %12, %14 : vector<8x256xf32>
      %cst_13 = arith.constant 0.000000e+00 : f32
      %16 = vector.broadcast %cst_13 : f32 to vector<8x256xf32>
      %17 = arith.cmpf oge, %15, %16 : vector<8x256xf32>
      %cst_14 = arith.constant 1.000000e-01 : f32
      %18 = vector.broadcast %cst_14 : f32 to vector<8x256xf32>
      %19 = arith.mulf %18, %15 : vector<8x256xf32>
      %20 = arith.select %17, %15, %19 : vector<8x256xi1>, vector<8x256xf32>
      %c0_15 = arith.constant 0 : index
      %c0_16 = arith.constant 0 : index
      %21 = vector.load %arg6[%c0_15, %c0_16] : memref<8x256xf32, #tpu.memory_space<vmem>>, vector<8x256xf32>
      tpu.vector_store %arg6[%c0_15, %c0_16], %20 {strides = array<i32>} : memref<8x256xf32, #tpu.memory_space<vmem>>, vector<8x256xf32>,
    } else {
    }
    return
  }
  func.func @transform_0(%arg0: i32, %arg1: i32, %arg2: i32) -> (i32, i32) {
    %c0_i32 = arith.constant 0 : i32
    return %arg0, %arg2 : i32, i32
  }
  func.func @transform_1(%arg0: i32, %arg1: i32, %arg2: i32) -> (i32, i32) {
    %c0_i32 = arith.constant 0 : i32
    return %arg2, %arg1 : i32, i32
  }
  func.func @transform_2(%arg0: i32, %arg1: i32, %arg2: i32) -> (i32, i32) {
    %c0_i32 = arith.constant 0 : i32
    %c0_i32_0 = arith.constant 0 : i32
    return %c0_i32, %arg1 : i32, i32
  }
  func.func @transform_3(%arg0: i32, %arg1: i32, %arg2: i32) -> (i32, i32) {
    %c0_i32 = arith.constant 0 : i32
    return %arg0, %arg1 : i32, i32
  }
}

</mosaic_0001>

<bundles_post_ra>
// kernel: pd_forward.4
= control target key start
LH: loop header
LB: loop body
LE: loop exit
PB: predicated region body
PF: predicated region fallthrough
CT: control target
= control target key end

     0   :  { %8 = vsyncpa [#allocation3], 0  ;;  %s506_s0 = inlined_call_operand.vmem [shape: f32[48,160], index: 0, kind: input, shape index: {}]   ;;  %s507_s1 = inlined_call_operand.hbm [shape: f32[160,128], index: 1, kind: input, shape index: {}]   ;;  %s508_s2 = inlined_call_operand.hbm [shape: f32[1,128], index: 2, kind: input, shape index: {}]   ;;  %s509_s3 = inlined_call_operand.vmem [shape: f32[48,128], index: 3, kind: output, shape index: {}]  }
   0x1   :  { %9 = vsyncpa [#allocation5], 0  ;;  %s377_s12 = smov [#allocation2]   ;;  %s329_s16 = scalar_lea.hbm %s507_s1, 2560 }
   0x2   :  { %s17_s13 = sshll.u32 %s377_s12, 4  ;;  %p330_p0 = scmp.ne.s32.totalorder %s507_s1, %s329_s16  ;;  %s18_s13 = int_to_ptr.vmem [resolvable:$true] %s17_s13 }
   0x3   :  { %p333_p1 = scmp.lt.u32.totalorder %s329_s16, %s507_s1 }
   0x5   :  { %p335_p2 = pnand %p333_p1, %p330_p0 }
   0x7   :  { %338 = shalt.err (!%p335_p2)
}
   0x8   :  { %s339_s21 = scalar_lea.vmem %s18_s13, 2560  ;;  %p344_p4 = scmp.lt.s32.totalorder %s18_s13, %s18_s13 }
   0x9   :  { %p340_p3 = scmp.ne.s32.totalorder %s18_s13, %s339_s21  ;;  %p345_p5 = scmp.lt.s32.totalorder %s339_s21, %s339_s21 }
   0xb   :  { %p346_p6 = por %p345_p5, %p344_p4 }
   0xd   :  { %p347_p7 = pnand %p346_p6, %p340_p3 }
   0xf   :  { %350 = shalt.err (!%p347_p7)
}
  0x10   :  { %s378_s22 = smov 128   ;;  %s379_s23 = smov 8  }
  0x11   :  { %23 = dma.hbm_to_vmem [thread:$0]  %s507_s1, 2560, %s18_s13, [#allocation3], %s378_s22, %s378_s22, %s379_s23  }
  0x12   :  { %s380_s26 = smov [#allocation4]   ;;  %s351_s30 = scalar_lea.hbm %s508_s2, 16 }
  0x13   :  { %s30_s27 = sshll.u32 %s380_s26, 4  ;;  %p352_p8 = scmp.ne.s32.totalorder %s508_s2, %s351_s30  ;;  %s31_s27 = int_to_ptr.vmem [resolvable:$true] %s30_s27 }
  0x14   :  { %p355_p9 = scmp.lt.u32.totalorder %s351_s30, %s508_s2 }
  0x16   :  { %p357_p10 = pnand %p355_p9, %p352_p8 }
  0x18   :  { %360 = shalt.err (!%p357_p10)
}
  0x19   :  { %s361_s8 = scalar_lea.vmem %s31_s27, 16  ;;  %s365_s1 = scalar_lea.vmem %s31_s27, 32 }
  0x1a   :  { %p362_p11 = scmp.ne.s32.totalorder %s31_s27, %s361_s8  ;;  %p366_p12 = scmp.lt.s32.totalorder %s31_s27, %s31_s27 }
  0x1b   :  { %p367_p13 = scmp.lt.s32.totalorder %s365_s1, %s361_s8 }
  0x1d   :  { %p368_p0 = por %p367_p13, %p366_p12 }
  0x1f   :  { %p369_p1 = pnand %p368_p0, %p362_p11 }
  0x21   :  { %372 = shalt.err (!%p369_p1)
}
  0x22   :  { %33 = dma.hbm_to_vmem [thread:$0]  %s508_s2, 16, %s31_s27, [#allocation5]  }
  0x23   :  { %373 = dma.done.wait [#allocation3], 2560  }
  0x24   :  { %374 = vsyncadd [#allocation3], 4294964736 }
  0x25   :  { %375 = dma.done.wait [#allocation5], 16  }
  0x26   :  { %376 = vsyncadd [#allocation5], 4294967280  ;;  %v381_v0 = vmov 0.0|0.0   ;;  %v68_v1 = vld [vmem:[#allocation2] sm:$0xff]  ;;  %v69_v2 = vld [vmem:[#allocation2 + $0x8] sm:$0xff]  ;;  %vm88_vm0 = vcmask 261120  }
  0x27   :  { %273 = vmatprep.subr.bf16.mxu0 %v381_v0  ;;  %303 = vmatprep.subr.bf16.mxu1 %v381_v0  ;;  %v70_v3 = vld [vmem:[#allocation2 + $0x10] sm:$0xff]  ;;  %v274_v4 = vpack.c.bf16 %v69_v2, %v68_v1  ;;  %v71_v5 = vld [vmem:[#allocation2 + $0x18] sm:$0xff]  ;;  %v72_v7 = vld [vmem:[#allocation2 + $0x20] sm:$0xff] }
  0x28   :  { %v277_v6 = vpack.c.bf16 %v71_v5, %v70_v3  ;;  %v73_v8 = vld [vmem:[#allocation2 + $0x28] sm:$0xff]  ;;  %v63_v11 = vld [vmem:[%s506_s0 + $0x38] sm:$0xff]  ;;  %v74_v12 = vld [vmem:[#allocation2 + $0x30] sm:$0xff] }
  0x29   :  { %275 = vmatpush1.bf16.msra.mxu0 %v274_v4  ;;  %313 = vmatpush1.bf16.msra.mxu1 %v274_v4  ;;  %v57_v9 = vld [vmem:[%s506_s0 + $0x8] sm:$0xff]  ;;  %v280_v10 = vpack.c.bf16 %v73_v8, %v72_v7  ;;  %v75_v13 = vld [vmem:[#allocation2 + $0x38] sm:$0xff]  ;;  %v76_v15 = vld [vmem:[#allocation2 + $0x40] sm:$0xff] }
  0x2a   :  { %276 = vmatprep.subr.bf16.mxu0 %v381_v0  ;;  %304 = vmatprep.subr.bf16.mxu1 %v381_v0  ;;  %v283_v14 = vpack.c.bf16 %v75_v13, %v74_v12  ;;  %v77_v16 = vld [vmem:[#allocation2 + $0x48] sm:$0xff]  ;;  %v78_v18 = vld [vmem:[#allocation2 + $0x50] sm:$0xff]  ;;  %v79_v19 = vld [vmem:[#allocation2 + $0x58] sm:$0xff] }
  0x2b   :  { %266 = vmatprep.mubr.msk.f32.mxu0 %vm88_vm0, %v57_v9  ;;  %269 = vmatprep.mubr.msk.f32.mxu1 %vm88_vm0, %v63_v11  ;;  %v286_v17 = vpack.c.bf16 %v77_v16, %v76_v15  ;;  %v289_v20 = vpack.c.bf16 %v79_v19, %v78_v18  ;;  %v80_v21 = vld [vmem:[#allocation2 + $0x60] sm:$0xff]  ;;  %v81_v22 = vld [vmem:[#allocation2 + $0x68] sm:$0xff]  ;;  %v82_v24 = vld [vmem:[#allocation2 + $0x70] sm:$0xff] }
  0x2c   :  { %v292_v23 = vpack.c.bf16 %v81_v22, %v80_v21  ;;  %v83_v25 = vld [vmem:[#allocation2 + $0x78] sm:$0xff]  ;;  %v84_v27 = vld [vmem:[#allocation2 + $0x80] sm:$0xff]  ;;  %v85_v28 = vld [vmem:[#allocation2 + $0x88] sm:$0xff] }
  0x2d   :  { %278 = vmatpush1.bf16.msra.mxu0 %v277_v6  ;;  %314 = vmatpush1.bf16.msra.mxu1 %v277_v6  ;;  %v295_v26 = vpack.c.bf16 %v83_v25, %v82_v24  ;;  %v298_v29 = vpack.c.bf16 %v85_v28, %v84_v27  ;;  %v86_v30 = vld [vmem:[#allocation2 + $0x90] sm:$0xff]  ;;  %v87_v31 = vld [vmem:[#allocation2 + $0x98] sm:$0xff]  ;;  %v56_v33 = vld [vmem:[%s506_s0] sm:$0xff] }
  0x2e   :  { %279 = vmatprep.subr.bf16.mxu0 %v381_v0  ;;  %305 = vmatprep.subr.bf16.mxu1 %v381_v0  ;;  %v301_v32 = vpack.c.bf16 %v87_v31, %v86_v30  ;;  %v62_v34 = vld [vmem:[%s506_s0 + $0x30] sm:$0xff]  ;;  %v59_v35 = vld [vmem:[%s506_s0 + $0x18] sm:$0xff]  ;;  %v65_v36 = vld [vmem:[%s506_s0 + $0x48] sm:$0xff] }
  0x2f   :  { %v58_v37 = vld [vmem:[%s506_s0 + $0x10] sm:$0xff]  ;;  %v64_v38 = vld [vmem:[%s506_s0 + $0x40] sm:$0xff]  ;;  %v61_v39 = vld [vmem:[%s506_s0 + $0x28] sm:$0xff] }
  0x30   :  { %v67_v40 = vld [vmem:[%s506_s0 + $0x58] sm:$0xff]  ;;  %v60_v41 = vld [vmem:[%s506_s0 + $0x20] sm:$0xff]  ;;  %v66_v42 = vld [vmem:[%s506_s0 + $0x50] sm:$0xff] }
  0x31   :  { %281 = vmatpush1.bf16.msra.mxu0 %v280_v10  ;;  %315 = vmatpush1.bf16.msra.mxu1 %v280_v10  ;;  %v272_v44 = vld [vmem:[#allocation4] ss:$0 sm:$0xff] }
  0x32   :  { %282 = vmatprep.subr.bf16.mxu0 %v381_v0  ;;  %306 = vmatprep.subr.bf16.mxu1 %v381_v0 }
  0x35   :  { %284 = vmatpush1.bf16.msra.mxu0 %v283_v14  ;;  %316 = vmatpush1.bf16.msra.mxu1 %v283_v14 }
  0x36   :  { %285 = vmatprep.subr.bf16.mxu0 %v381_v0  ;;  %307 = vmatprep.subr.bf16.mxu1 %v381_v0 }
  0x39   :  { %287 = vmatpush1.bf16.msra.mxu0 %v286_v17  ;;  %317 = vmatpush1.bf16.msra.mxu1 %v286_v17 }
  0x3a   :  { %288 = vmatprep.subr.bf16.mxu0 %v381_v0  ;;  %308 = vmatprep.subr.bf16.mxu1 %v381_v0 }
  0x3d   :  { %290 = vmatpush1.bf16.msra.mxu0 %v289_v20  ;;  %318 = vmatpush1.bf16.msra.mxu1 %v289_v20 }
  0x3e   :  { %291 = vmatprep.subr.bf16.mxu0 %v381_v0  ;;  %309 = vmatprep.subr.bf16.mxu1 %v381_v0 }
  0x41   :  { %293 = vmatpush1.bf16.msra.mxu0 %v292_v23  ;;  %319 = vmatpush1.bf16.msra.mxu1 %v292_v23 }
  0x42   :  { %294 = vmatprep.subr.bf16.mxu0 %v381_v0  ;;  %310 = vmatprep.subr.bf16.mxu1 %v381_v0 }
  0x45   :  { %296 = vmatpush1.bf16.msra.mxu0 %v295_v26  ;;  %320 = vmatpush1.bf16.msra.mxu1 %v295_v26 }
  0x46   :  { %297 = vmatprep.subr.bf16.mxu0 %v381_v0  ;;  %311 = vmatprep.subr.bf16.mxu1 %v381_v0 }
  0x49   :  { %299 = vmatpush1.bf16.msra.mxu0 %v298_v29  ;;  %321 = vmatpush1.bf16.msra.mxu1 %v298_v29 }
  0x4a   :  { %300 = vmatprep.subr.bf16.mxu0 %v381_v0  ;;  %312 = vmatprep.subr.bf16.mxu1 %v381_v0 }
  0x4d   :  { %302 = vmatpush1.bf16.msra.mxu0 %v301_v32  ;;  %322 = vmatpush1.bf16.msra.mxu1 %v301_v32 }
  0x50   :  { %172 = vmatmul.mubr.f32.vlgmr.msra.gmra.mrb[0].mxu0 %v56_v33  ;;  %187 = vmatmul.mubr.f32.vlgmr.msra.gmra.mrb[0].mxu1 %v62_v34 }
  0x51   :  { %267 = vmatprep.mubr.msk.f32.mxu0 %vm88_vm0, %v59_v35  ;;  %270 = vmatprep.mubr.msk.f32.mxu1 %vm88_vm0, %v65_v36 }
  0x54   :  { %177 = vmatmul.mubr.f32.gmra.mrb[2].mxu0 %v58_v37  ;;  %192 = vmatmul.mubr.f32.gmra.mrb[2].mxu1 %v64_v38 }
  0x55   :  { %268 = vmatprep.mubr.msk.f32.mxu0 %vm88_vm0, %v61_v39  ;;  %271 = vmatprep.mubr.msk.f32.mxu1 %vm88_vm0, %v67_v40 }
  0x58   :  { %182 = vmatmul.mubr.f32.gmra.mrb[4].mxu0 %v60_v41  ;;  %197 = vmatmul.mubr.f32.gmra.mrb[4].mxu1 %v66_v42 }
 0x123   :  { %v173_v43 = vpop.f32.mrb[0].mxu0  ;;  %v188_v45 = vpop.f32.mrb[0].mxu1 }
 0x124   :  { %v175_v46 = vpop.f32.mrb[1].mxu0  ;;  %v190_v47 = vpop.f32.mrb[1].mxu1  ;;  %v230_v48 = vadd.f32 %v272_v44, %v173_v43  ;;  %v233_v49 = vadd.f32 %v272_v44, %v188_v45 }
 0x126   :  { %vm236_vm1 = vcmp.ge.f32.partialorder %v230_v48, 0.0  ;;  %v242_v52 = vmul.f32 0.1, %v230_v48  ;;  %vm239_vm2 = vcmp.ge.f32.partialorder %v233_v49, 0.0  ;;  %v245_v53 = vmul.f32 0.1, %v233_v49 }
 0x127   :  { %v178_v50 = vpop.f32.mrb[2].mxu0  ;;  %v193_v51 = vpop.f32.mrb[2].mxu1 }
 0x128   :  { %v180_v54 = vpop.f32.mrb[3].mxu0  ;;  %v195_v55 = vpop.f32.mrb[3].mxu1  ;;  %v248_v56 = vsel %vm236_vm1, %v230_v48, %v242_v52  ;;  %v251_v57 = vsel %vm239_vm2, %v233_v49, %v245_v53  ;;  %v231_v58 = vadd.f32 %v272_v44, %v178_v50  ;;  %v234_v59 = vadd.f32 %v272_v44, %v193_v51 }
 0x129   :  { %254 = vst [vmem:[%s509_s3] sm:$0xff] %v248_v56  ;;  %257 = vst [vmem:[%s509_s3 + $0x18] sm:$0xff] %v251_v57 }
 0x12a   :  { %vm237_vm3 = vcmp.ge.f32.partialorder %v231_v58, 0.0  ;;  %v243_v0 = vmul.f32 0.1, %v231_v58  ;;  %vm240_vm4 = vcmp.ge.f32.partialorder %v234_v59, 0.0  ;;  %v246_v1 = vmul.f32 0.1, %v234_v59 }
 0x12b   :  { %v183_v60 = vpop.f32.mrb[4].mxu0  ;;  %v198_v61 = vpop.f32.mrb[4].mxu1 }
 0x12c   :  { %v185_v62 = vpop.f32.mrb[5].mxu0  ;;  %v200_v63 = vpop.f32.mrb[5].mxu1  ;;  %v232_v2 = vadd.f32 %v272_v44, %v183_v60  ;;  %v235_v3 = vadd.f32 %v272_v44, %v198_v61  ;;  %v249_v4 = vsel %vm237_vm3, %v231_v58, %v243_v0  ;;  %v252_v5 = vsel %vm240_vm4, %v234_v59, %v246_v1 }
 0x12d   :  { %255 = vst [vmem:[%s509_s3 + $0x8] sm:$0xff] %v249_v4  ;;  %258 = vst [vmem:[%s509_s3 + $0x20] sm:$0xff] %v252_v5 }
 0x12e   :  { %vm238_vm5 = vcmp.ge.f32.partialorder %v232_v2, 0.0  ;;  %v244_v6 = vmul.f32 0.1, %v232_v2  ;;  %vm241_vm6 = vcmp.ge.f32.partialorder %v235_v3, 0.0  ;;  %v247_v7 = vmul.f32 0.1, %v235_v3 }
 0x130   :  { %v250_v8 = vsel %vm238_vm5, %v232_v2, %v244_v6  ;;  %v253_v9 = vsel %vm241_vm6, %v235_v3, %v247_v7 }
 0x131   :  { %256 = vst [vmem:[%s509_s3 + $0x10] sm:$0xff] %v250_v8  ;;  %259 = vst [vmem:[%s509_s3 + $0x28] sm:$0xff] %v253_v9 }
 0x132   :  { %264 = vsyncpa [#allocation3], 1 }
 0x133   :  { %265 = vsyncpa [#allocation5], 1 }

// kernel: pd_forward.5
= control target key start
LH: loop header
LB: loop body
LE: loop exit
PB: predicated region body
PF: predicated region fallthrough
CT: control target
= control target key end

     0   :  { %8 = vsyncpa [#allocation3], 0  ;;  %s1700_s0 = inlined_call_operand.vmem [shape: f32[16,640], index: 0, kind: input, shape index: {}]   ;;  %s1701_s1 = inlined_call_operand.hbm [shape: f32[640,512], index: 1, kind: input, shape index: {}]   ;;  %s1702_s2 = inlined_call_operand.hbm [shape: f32[1,512], index: 2, kind: input, shape index: {}]   ;;  %s1703_s3 = inlined_call_operand.vmem [shape: f32[16,512], index: 3, kind: output, shape index: {}]  }
   0x1   :  { %10 = vsyncpa [#allocation3 + $0x1], 0 }
   0x2   :  { %11 = vsyncpa [#allocation5], 0 }
   0x3   :  { %13 = vsyncpa [#allocation5 + $0x1], 0  ;;  %s1327_s12 = smov 0   ;;  %s1329_s13 = smov 0  }
   0x4   :  { %s1331_s14 = smov 0   ;;  %s1333_s15 = smov 0  }
   0x5   :  { %s1335_s16 = smov 0   ;;  %s1337_s17 = smov 0  }
   0x6 LB: > { %s914_s18 = sadd.s32 4294967295, %s1299_s17   ;;  %s34_s19 = sadd.s32 1, %s1295_s16  ;;  %s1299_s17 = sphi %s1337_s17, %s19_s17   ;;  %s1295_s16 = sphi %s1335_s16, %s1718_s16   ;;  %s1291_s15 = sphi %s1333_s15, %s1717_s15   ;;  %s1287_s14 = sphi %s1331_s14, %s1716_s14   ;;  %s1283_s13 = sphi %s1329_s13, %s1715_s13   ;;  %s1279_s12 = sphi %s1327_s12, %s1714_s12  }
   0x7   : > { %p36_p0 = scmp.ge.s32.totalorder %s34_s19, 2  ;;  %s75_s20 = sadd.s32 1, %s1287_s14 }
   0x8   : > { %p82_p1 = scmp.ne.s32.totalorder %s1287_s14, %s1283_s13  ;;  %p83_p2 = scmp.eq.s32.totalorder %s1299_s17, 0 }
   0x9   : > { %s1720_s19 = smov (%p36_p0, %s34_s19), 0  ;;  %p88_p4 = scmp.ne.s32.totalorder %s1283_s13, %s1279_s12 }
   0xa   : > { %p1363_p3 = por %p83_p2, %p82_p1  ;;  %s71_s22 = ssub.s32 %s1295_s16, %s1720_s19 }
   0xb   : > { %p89_p5 = scmp.eq.s32.totalorder %s914_s18, 0  ;;  %p73_p6 = scmp.eq.s32.totalorder %s71_s22, 0 }
   0xc   : > { %p140_p7 = scmp.eq.s32.totalorder %s914_s18, 1  ;;  %p1132_p10 = scmp.lt.s32.totalorder %s1299_s17, 2 }
   0xd   : > { %p1370_p8 = por %p89_p5, %p88_p4  ;;  %s1383_s26 = sand.u32 1, %s1287_s14  }
   0xe   : > { %s1375_s24 = scalar_select %p73_p6, %s1287_s14, %s75_s20  }
   0xf   : > { %s1706_s23 = scalar_select %p1370_p8, 1, 0 }
  0x10   : > { %p1377_p9 = por %p140_p7, %p82_p1  ;;  %s932_s27 = sshll.u32 %s1295_s16, 8 }
  0x11   : > { %s1119_s28 = smul.u32 1280, %s1383_s26  ;;  %s1390_s4 = scalar_lea.hbm %s1701_s1, %s932_s27 }
  0x12   : > { %s1707_s25 = scalar_select %p1377_p9, 1, 0 }
  0x13   : > { %p1394_p11 = pnand %p1132_p10, %p1363_p3  ;;  %s185_s6 = scalar_lea.vmem [#allocation2], %s1119_s28 }
  0x14   : > { %s195_s7 = sshll.u32 %s185_s6, 4  ;;  %s182_s8 = scalar_lea.sflag [#allocation3], %s1383_s26  ;;  %s1398_s7 = int_to_ptr.vmem [resolvable:$true] %s195_s7 }
  0x15   : > { %s1185_s9 = scalar_lea.hbm %s1390_s4, 20480  ;;  %p1187_p0 = pneg %p1394_p11 }
  0x16   : > { %p1186_p13 = scmp.ne.s32.totalorder %s1390_s4, %s1185_s9  ;;  %s1190_s12 = scalar_lea.hbm %s1701_s1, 40960 }
  0x17   : > { %p1191_p3 = scmp.lt.u32.totalorder %s1390_s4, %s1701_s1  ;;  %p1192_p4 = scmp.lt.u32.totalorder %s1190_s12, %s1185_s9 }
  0x18   : > { %p1188_p1 = pnand %p1187_p0, %p1186_p13  ;;  %p1194_p6 = scmp.lt.u32.totalorder %s1185_s9, %s1390_s4 }
  0x19   : > { %p1193_p5 = por %p1192_p4, %p1191_p3 }
  0x1a   : > { %p1189_p2 = pneg %p1188_p1 }
  0x1b   : > { %p1195_p7 = por %p1194_p6, %p1193_p5 }
  0x1d   : > { %p1196_p10 = pnand %p1195_p7, %p1189_p2 }
  0x1f   : > { %1199 = shalt.err (!%p1196_p10)
}
  0x20   : > { %s1200_s21 = scalar_lea.vmem %s1398_s7, 20480  ;;  %s1301_s22 = smov [#allocation2]  }
  0x21   : > { %p1201_p13 = scmp.ne.s32.totalorder %s1398_s7, %s1200_s21  ;;  %s1205_s27 = sshll.u32 %s1301_s22, 4  ;;  %s1206_s27 = int_to_ptr.vmem [resolvable:$false] %s1205_s27 }
  0x22   : > { %s1207_s28 = scalar_lea.vmem %s1206_s27, 40960  ;;  %p1208_p9 = scmp.lt.s32.totalorder %s1398_s7, %s1206_s27 }
  0x23   : > { %p1203_p1 = pnand %p1201_p13, %p1187_p0  ;;  %p1209_p3 = scmp.lt.s32.totalorder %s1207_s28, %s1200_s21 }
  0x25   : > { %p1204_p12 = pneg %p1203_p1  ;;  %p1210_p4 = por %p1209_p3, %p1208_p9 }
  0x27   : > { %p1211_p5 = pnand %p1210_p4, %p1204_p12 }
  0x29   : > { %1214 = shalt.err (!%p1211_p5)
}
  0x2a   : > { %s1302_s29 = smov 512   ;;  %s1303_s30 = smov 256  }
  0x2b   : > { %s1304_s6 = smov 16   ;;  %p222_p2 = scmp.lt.s32.totalorder %s1299_s17, 3 }
  0x2c   : > { %1128 = dma.hbm_to_vmem [thread:$0]  (!%p1394_p11), %s1390_s4, 20480, %s1398_s7, %s182_s8, %s1302_s29, %s1303_s30, %s1304_s6  }
  0x2d   : > { %s921_s9 = sshll.u32 %s1383_s26, 1  ;;  %s933_s10 = sshll.u32 %s1295_s16, 5 }
  0x2e   : > { %p1709_p9 = scmp.ge.s32.totalorder %s1299_s17, 1  ;;  %s1441_s20 = scalar_lea.hbm %s1702_s2, %s933_s10 }
  0x2f   : > { %s209_s21 = scalar_lea.vmem [#allocation4], %s921_s9  ;;  %s206_s4 = scalar_lea.sflag [#allocation5], %s1383_s26 }
  0x30   : > { %p1434_p12 = pnand %p1709_p9, %p222_p2  ;;  %s217_s22 = sshll.u32 %s209_s21, 4  ;;  %s218_s22 = int_to_ptr.vmem [resolvable:$true] %s217_s22 }
  0x31   : > { %s1215_s7 = scalar_lea.hbm %s1441_s20, 32  ;;  %s1220_s28 = scalar_lea.hbm %s1702_s2, 64 }
  0x32   : > { %s1710_s11 = scalar_select %p1434_p12, 1, 0 }
  0x33   : > { %p1216_p6 = scmp.ne.s32.totalorder %s1441_s20, %s1215_s7  ;;  %p1221_p13 = scmp.lt.u32.totalorder %s1441_s20, %s1702_s2 }
  0x34   : > { %p1222_p1 = scmp.lt.u32.totalorder %s1220_s28, %s1215_s7  ;;  %p1224_p4 = scmp.lt.u32.totalorder %s1215_s7, %s1441_s20 }
  0x35   : > { %p1218_p7 = pnand %p1216_p6, %p1187_p0 }
  0x36   : > { %p1223_p3 = por %p1222_p1, %p1221_p13 }
  0x37   : > { %p1219_p10 = pneg %p1218_p7 }
  0x38   : > { %p1225_p5 = por %p1224_p4, %p1223_p3 }
  0x3a   : > { %p1226_p2 = pnand %p1225_p5, %p1219_p10 }
  0x3c   : > { %1229 = shalt.err (!%p1226_p2)
}
  0x3d   : > { %s1230_s26 = scalar_lea.vmem %s218_s22, 32  ;;  %s1305_s6 = smov [#allocation4]  }
  0x3e   : > { %p1231_p9 = scmp.ne.s32.totalorder %s218_s22, %s1230_s26  ;;  %s1235_s9 = sshll.u32 %s1305_s6, 4  ;;  %s1236_s9 = int_to_ptr.vmem [resolvable:$false] %s1235_s9 }
  0x3f   : > { %s1237_s10 = scalar_lea.vmem %s1236_s9, 64  ;;  %p1238_p8 = scmp.lt.s32.totalorder %s218_s22, %s1236_s9 }
  0x40   : > { %p1233_p6 = pnand %p1231_p9, %p1187_p0  ;;  %p1239_p12 = scmp.lt.s32.totalorder %s1237_s10, %s1230_s26 }
  0x42   : > { %p1234_p7 = pneg %p1233_p6  ;;  %p1240_p1 = por %p1239_p12, %p1238_p8 }
  0x44   : > { %p1241_p13 = pnand %p1240_p1, %p1234_p7 }
  0x46   : > { %1244 = shalt.err (!%p1241_p13)
}
  0x47   : > { %1131 = dma.hbm_to_vmem [thread:$0]  (!%p1394_p11), %s1441_s20, 32, %s218_s22, %s206_s4  }
  0x48   : > { %p1711_p10 = scmp.ne.s32.totalorder %s1710_s11, 0 }
  0x49   : > { %s1466_s12 = sand.u32 (!%p1711_p10), 1, %s1283_s13   ;;  %p1712_p8 = scmp.ne.s32.totalorder (!%p1711_p10), %s1706_s23, 0 }
  0x4a   : > { %226 = sbr.rel (%p1711_p10) target bundleno = 415 (0x19f), region = 32  ;;  %s229_s21 = scalar_lea.sflag (!%p1711_p10), [#allocation3], %s1466_s12 }
  0x4b   : > { %s1120_s18 = smul.u32 (!%p1711_p10), 1280, %s1466_s12 }
  0x4d   : > { %s1470_s7 = scalar_lea.vmem (!%p1711_p10), [#allocation2], %s1120_s18 }
  0x51   : > { %1270 = dma.done.wait (%p1712_p8), %s229_s21, 20480  }
  0x52   : > { %1272 = vsyncadd (%p1712_p8), %s229_s21, 4294946816  ;;  %s925_s5 = sshll.u32 %s1466_s12, 1  ;;  %s238_s11 = scalar_lea.sflag [#allocation5], %s1466_s12 }
  0x53   : > { %s1478_s20 = scalar_lea.vmem [#allocation4], %s925_s5 }
  0x54   : > { %1274 = dma.done.wait (%p1712_p8), %s238_s11, 32  }
  0x55   : > { %1276 = vsyncadd (%p1712_p8), %s238_s11, 4294967264  ;;  %v318_v0 = vld [vmem:[%s1470_s7 + $0x8] sm:$0xff]  ;;  %v320_v1 = vld [vmem:[%s1470_s7 + $0x18] sm:$0xff]  ;;  %p1713_p11 = scmp.ne.s32.totalorder %s1707_s25, 0 }
  0x56   : > { %v382_v2 = vld [vmem:[%s1470_s7 + $0x208] sm:$0xff]  ;;  %v935_v3 = vpack.c.bf16 %v320_v1, %v318_v0  ;;  %v384_v4 = vld [vmem:[%s1470_s7 + $0x218] sm:$0xff]  ;;  %v317_v5 = vld [vmem:[%s1470_s7] sm:$0xff] }
  0x57   : > { %v319_v6 = vld [vmem:[%s1470_s7 + $0x10] sm:$0xff]  ;;  %v999_v7 = vpack.c.bf16 %v384_v4, %v382_v2  ;;  %v381_v9 = vld [vmem:[%s1470_s7 + $0x200] sm:$0xff]  ;;  %v322_v11 = vld [vmem:[%s1470_s7 + $0x28] sm:$0xff] }
  0x58   : > { %v937_v8 = vpack.c.bf16 %v319_v6, %v317_v5  ;;  %v383_v10 = vld [vmem:[%s1470_s7 + $0x210] sm:$0xff]  ;;  %936 = vmatprep.subr.bf16.mxu1 %v935_v3  ;;  %v324_v13 = vld [vmem:[%s1470_s7 + $0x38] sm:$0xff]  ;;  %v386_v14 = vld [vmem:[%s1470_s7 + $0x228] sm:$0xff] }
  0x59   : > { %v1001_v12 = vpack.c.bf16 %v383_v10, %v381_v9  ;;  %v388_v15 = vld [vmem:[%s1470_s7 + $0x238] sm:$0xff]  ;;  %1000 = vmatprep.subr.bf16.mxu0 %v999_v7  ;;  %v939_v16 = vpack.c.bf16 %v324_v13, %v322_v11  ;;  %v321_v18 = vld [vmem:[%s1470_s7 + $0x20] sm:$0xff]  ;;  %v323_v19 = vld [vmem:[%s1470_s7 + $0x30] sm:$0xff] }
  0x5a   : > { %938 = vmatpush1.bf16.msra.mxu1 %v937_v8  ;;  %v1003_v17 = vpack.c.bf16 %v388_v15, %v386_v14  ;;  %v385_v20 = vld [vmem:[%s1470_s7 + $0x220] sm:$0xff]  ;;  %v941_v21 = vpack.c.bf16 %v323_v19, %v321_v18  ;;  %v387_v22 = vld [vmem:[%s1470_s7 + $0x230] sm:$0xff]  ;;  %v326_v23 = vld [vmem:[%s1470_s7 + $0x48] sm:$0xff] }
  0x5b   : > { %1002 = vmatpush1.bf16.msra.mxu0 %v1001_v12  ;;  %v328_v24 = vld [vmem:[%s1470_s7 + $0x58] sm:$0xff]  ;;  %940 = vmatprep.subr.bf16.mxu1 %v939_v16  ;;  %v1005_v25 = vpack.c.bf16 %v387_v22, %v385_v20  ;;  %v390_v27 = vld [vmem:[%s1470_s7 + $0x248] sm:$0xff]  ;;  %v325_v29 = vld [vmem:[%s1470_s7 + $0x40] sm:$0xff] }
  0x5c   : > { %1004 = vmatprep.subr.bf16.mxu0 %v1003_v17  ;;  %v943_v26 = vpack.c.bf16 %v328_v24, %v326_v23  ;;  %v392_v28 = vld [vmem:[%s1470_s7 + $0x258] sm:$0xff]  ;;  %v327_v31 = vld [vmem:[%s1470_s7 + $0x50] sm:$0xff]  ;;  %v389_v32 = vld [vmem:[%s1470_s7 + $0x240] sm:$0xff] }
  0x5d   : > { %v1007_v30 = vpack.c.bf16 %v392_v28, %v390_v27  ;;  %v391_v33 = vld [vmem:[%s1470_s7 + $0x250] sm:$0xff]  ;;  %v945_v34 = vpack.c.bf16 %v327_v31, %v325_v29  ;;  %v330_v35 = vld [vmem:[%s1470_s7 + $0x68] sm:$0xff]  ;;  %v332_v36 = vld [vmem:[%s1470_s7 + $0x78] sm:$0xff] }
  0x5e   : > { %942 = vmatpush1.bf16.msra.mxu1 %v941_v21  ;;  %v394_v37 = vld [vmem:[%s1470_s7 + $0x268] sm:$0xff]  ;;  %v1009_v38 = vpack.c.bf16 %v391_v33, %v389_v32  ;;  %v947_v39 = vpack.c.bf16 %v332_v36, %v330_v35  ;;  %v396_v40 = vld [vmem:[%s1470_s7 + $0x278] sm:$0xff]  ;;  %v329_v41 = vld [vmem:[%s1470_s7 + $0x60] sm:$0xff] }
  0x5f   : > { %1006 = vmatpush1.bf16.msra.mxu0 %v1005_v25  ;;  %944 = vmatprep.subr.bf16.mxu1 %v943_v26  ;;  %v331_v42 = vld [vmem:[%s1470_s7 + $0x70] sm:$0xff]  ;;  %v1011_v43 = vpack.c.bf16 %v396_v40, %v394_v37  ;;  %v393_v44 = vld [vmem:[%s1470_s7 + $0x260] sm:$0xff]  ;;  %v334_v46 = vld [vmem:[%s1470_s7 + $0x88] sm:$0xff] }
  0x60   : > { %1008 = vmatprep.subr.bf16.mxu0 %v1007_v30  ;;  %v395_v45 = vld [vmem:[%s1470_s7 + $0x270] sm:$0xff]  ;;  %v336_v47 = vld [vmem:[%s1470_s7 + $0x98] sm:$0xff]  ;;  %v398_v48 = vld [vmem:[%s1470_s7 + $0x288] sm:$0xff]  ;;  %v949_v50 = vpack.c.bf16 %v331_v42, %v329_v41 }
  0x61   : > { %v400_v49 = vld [vmem:[%s1470_s7 + $0x298] sm:$0xff]  ;;  %v1013_v51 = vpack.c.bf16 %v395_v45, %v393_v44  ;;  %v951_v52 = vpack.c.bf16 %v336_v47, %v334_v46  ;;  %v333_v53 = vld [vmem:[%s1470_s7 + $0x80] sm:$0xff]  ;;  %v335_v54 = vld [vmem:[%s1470_s7 + $0x90] sm:$0xff] }
  0x62   : > { %946 = vmatpush1.bf16.msra.mxu1 %v945_v34  ;;  %v397_v55 = vld [vmem:[%s1470_s7 + $0x280] sm:$0xff]  ;;  %v1015_v56 = vpack.c.bf16 %v400_v49, %v398_v48  ;;  %v399_v57 = vld [vmem:[%s1470_s7 + $0x290] sm:$0xff]  ;;  %v338_v58 = vld [vmem:[%s1470_s7 + $0xa8] sm:$0xff]  ;;  %v953_v62 = vpack.c.bf16 %v335_v54, %v333_v53 }
  0x63   : > { %1010 = vmatpush1.bf16.msra.mxu0 %v1009_v38  ;;  %948 = vmatprep.subr.bf16.mxu1 %v947_v39  ;;  %v340_v59 = vld [vmem:[%s1470_s7 + $0xb8] sm:$0xff]  ;;  %v402_v60 = vld [vmem:[%s1470_s7 + $0x2a8] sm:$0xff]  ;;  %v1017_v63 = vpack.c.bf16 %v399_v57, %v397_v55  ;;  %v337_v1 = vld [vmem:[%s1470_s7 + $0xa0] sm:$0xff] }
  0x64   : > { %1012 = vmatprep.subr.bf16.mxu0 %v1011_v43  ;;  %v404_v61 = vld [vmem:[%s1470_s7 + $0x2b8] sm:$0xff]  ;;  %v955_v0 = vpack.c.bf16 %v340_v59, %v338_v58  ;;  %v339_v2 = vld [vmem:[%s1470_s7 + $0xb0] sm:$0xff]  ;;  %v401_v3 = vld [vmem:[%s1470_s7 + $0x2a0] sm:$0xff] }
  0x65   : > { %v1019_v4 = vpack.c.bf16 %v404_v61, %v402_v60  ;;  %v403_v5 = vld [vmem:[%s1470_s7 + $0x2b0] sm:$0xff]  ;;  %v342_v6 = vld [vmem:[%s1470_s7 + $0xc8] sm:$0xff]  ;;  %v344_v7 = vld [vmem:[%s1470_s7 + $0xd8] sm:$0xff]  ;;  %v957_v10 = vpack.c.bf16 %v339_v2, %v337_v1 }
  0x66   : > { %950 = vmatpush1.bf16.msra.mxu1 %v949_v50  ;;  %v406_v8 = vld [vmem:[%s1470_s7 + $0x2c8] sm:$0xff]  ;;  %v408_v9 = vld [vmem:[%s1470_s7 + $0x2d8] sm:$0xff]  ;;  %v1021_v11 = vpack.c.bf16 %v403_v5, %v401_v3  ;;  %v959_v12 = vpack.c.bf16 %v344_v7, %v342_v6  ;;  %v341_v13 = vld [vmem:[%s1470_s7 + $0xc0] sm:$0xff] }
  0x67   : > { %1014 = vmatpush1.bf16.msra.mxu0 %v1013_v51  ;;  %952 = vmatprep.subr.bf16.mxu1 %v951_v52  ;;  %v343_v14 = vld [vmem:[%s1470_s7 + $0xd0] sm:$0xff]  ;;  %v405_v15 = vld [vmem:[%s1470_s7 + $0x2c0] sm:$0xff]  ;;  %v1023_v16 = vpack.c.bf16 %v408_v9, %v406_v8  ;;  %v346_v18 = vld [vmem:[%s1470_s7 + $0xe8] sm:$0xff] }
  0x68   : > { %1016 = vmatprep.subr.bf16.mxu0 %v1015_v56  ;;  %v407_v17 = vld [vmem:[%s1470_s7 + $0x2d0] sm:$0xff]  ;;  %v348_v19 = vld [vmem:[%s1470_s7 + $0xf8] sm:$0xff]  ;;  %v410_v20 = vld [vmem:[%s1470_s7 + $0x2e8] sm:$0xff]  ;;  %v961_v22 = vpack.c.bf16 %v343_v14, %v341_v13 }
  0x69   : > { %v412_v21 = vld [vmem:[%s1470_s7 + $0x2f8] sm:$0xff]  ;;  %v1025_v23 = vpack.c.bf16 %v407_v17, %v405_v15  ;;  %v963_v24 = vpack.c.bf16 %v348_v19, %v346_v18  ;;  %v345_v25 = vld [vmem:[%s1470_s7 + $0xe0] sm:$0xff]  ;;  %v347_v26 = vld [vmem:[%s1470_s7 + $0xf0] sm:$0xff] }
  0x6a   : > { %954 = vmatpush1.bf16.msra.mxu1 %v953_v62  ;;  %v409_v27 = vld [vmem:[%s1470_s7 + $0x2e0] sm:$0xff]  ;;  %v1027_v28 = vpack.c.bf16 %v412_v21, %v410_v20  ;;  %v411_v29 = vld [vmem:[%s1470_s7 + $0x2f0] sm:$0xff]  ;;  %v350_v30 = vld [vmem:[%s1470_s7 + $0x108] sm:$0xff]  ;;  %v965_v34 = vpack.c.bf16 %v347_v26, %v345_v25 }
  0x6b   : > { %1018 = vmatpush1.bf16.msra.mxu0 %v1017_v63  ;;  %956 = vmatprep.subr.bf16.mxu1 %v955_v0  ;;  %v352_v31 = vld [vmem:[%s1470_s7 + $0x118] sm:$0xff]  ;;  %v414_v32 = vld [vmem:[%s1470_s7 + $0x308] sm:$0xff]  ;;  %v1029_v35 = vpack.c.bf16 %v411_v29, %v409_v27  ;;  %v349_v37 = vld [vmem:[%s1470_s7 + $0x100] sm:$0xff] }
  0x6c   : > { %1020 = vmatprep.subr.bf16.mxu0 %v1019_v4  ;;  %v416_v33 = vld [vmem:[%s1470_s7 + $0x318] sm:$0xff]  ;;  %v967_v36 = vpack.c.bf16 %v352_v31, %v350_v30  ;;  %v351_v38 = vld [vmem:[%s1470_s7 + $0x110] sm:$0xff]  ;;  %v413_v39 = vld [vmem:[%s1470_s7 + $0x300] sm:$0xff] }
  0x6d   : > { %v1031_v40 = vpack.c.bf16 %v416_v33, %v414_v32  ;;  %v415_v41 = vld [vmem:[%s1470_s7 + $0x310] sm:$0xff]  ;;  %v354_v42 = vld [vmem:[%s1470_s7 + $0x128] sm:$0xff]  ;;  %v356_v43 = vld [vmem:[%s1470_s7 + $0x138] sm:$0xff]  ;;  %v969_v46 = vpack.c.bf16 %v351_v38, %v349_v37 }
  0x6e   : > { %958 = vmatpush1.bf16.msra.mxu1 %v957_v10  ;;  %v418_v44 = vld [vmem:[%s1470_s7 + $0x328] sm:$0xff]  ;;  %v420_v45 = vld [vmem:[%s1470_s7 + $0x338] sm:$0xff]  ;;  %v1033_v47 = vpack.c.bf16 %v415_v41, %v413_v39  ;;  %v971_v48 = vpack.c.bf16 %v356_v43, %v354_v42  ;;  %v353_v49 = vld [vmem:[%s1470_s7 + $0x120] sm:$0xff] }
  0x6f   : > { %1022 = vmatpush1.bf16.msra.mxu0 %v1021_v11  ;;  %960 = vmatprep.subr.bf16.mxu1 %v959_v12  ;;  %v355_v50 = vld [vmem:[%s1470_s7 + $0x130] sm:$0xff]  ;;  %v417_v51 = vld [vmem:[%s1470_s7 + $0x320] sm:$0xff]  ;;  %v1035_v52 = vpack.c.bf16 %v420_v45, %v418_v44  ;;  %v358_v54 = vld [vmem:[%s1470_s7 + $0x148] sm:$0xff] }
  0x70   : > { %1024 = vmatprep.subr.bf16.mxu0 %v1023_v16  ;;  %v419_v53 = vld [vmem:[%s1470_s7 + $0x330] sm:$0xff]  ;;  %v360_v55 = vld [vmem:[%s1470_s7 + $0x158] sm:$0xff]  ;;  %v422_v56 = vld [vmem:[%s1470_s7 + $0x348] sm:$0xff]  ;;  %v973_v58 = vpack.c.bf16 %v355_v50, %v353_v49 }
  0x71   : > { %v424_v57 = vld [vmem:[%s1470_s7 + $0x358] sm:$0xff]  ;;  %v1037_v59 = vpack.c.bf16 %v419_v53, %v417_v51  ;;  %v975_v60 = vpack.c.bf16 %v360_v55, %v358_v54  ;;  %v357_v61 = vld [vmem:[%s1470_s7 + $0x140] sm:$0xff]  ;;  %v359_v62 = vld [vmem:[%s1470_s7 + $0x150] sm:$0xff] }
  0x72   : > { %962 = vmatpush1.bf16.msra.mxu1 %v961_v22  ;;  %v421_v63 = vld [vmem:[%s1470_s7 + $0x340] sm:$0xff]  ;;  %v1039_v0 = vpack.c.bf16 %v424_v57, %v422_v56  ;;  %v423_v1 = vld [vmem:[%s1470_s7 + $0x350] sm:$0xff]  ;;  %v362_v2 = vld [vmem:[%s1470_s7 + $0x168] sm:$0xff]  ;;  %v977_v6 = vpack.c.bf16 %v359_v62, %v357_v61 }
  0x73   : > { %1026 = vmatpush1.bf16.msra.mxu0 %v1025_v23  ;;  %964 = vmatprep.subr.bf16.mxu1 %v963_v24  ;;  %v364_v3 = vld [vmem:[%s1470_s7 + $0x178] sm:$0xff]  ;;  %v426_v4 = vld [vmem:[%s1470_s7 + $0x368] sm:$0xff]  ;;  %v361_v7 = vld [vmem:[%s1470_s7 + $0x160] sm:$0xff]  ;;  %v1041_v8 = vpack.c.bf16 %v423_v1, %v421_v63 }
  0x74   : > { %1028 = vmatprep.subr.bf16.mxu0 %v1027_v28  ;;  %v428_v5 = vld [vmem:[%s1470_s7 + $0x378] sm:$0xff]  ;;  %v979_v9 = vpack.c.bf16 %v364_v3, %v362_v2  ;;  %v363_v10 = vld [vmem:[%s1470_s7 + $0x170] sm:$0xff]  ;;  %v425_v11 = vld [vmem:[%s1470_s7 + $0x360] sm:$0xff] }
  0x75   : > { %v427_v12 = vld [vmem:[%s1470_s7 + $0x370] sm:$0xff]  ;;  %v1043_v13 = vpack.c.bf16 %v428_v5, %v426_v4  ;;  %v366_v14 = vld [vmem:[%s1470_s7 + $0x188] sm:$0xff]  ;;  %v368_v15 = vld [vmem:[%s1470_s7 + $0x198] sm:$0xff]  ;;  %v981_v20 = vpack.c.bf16 %v363_v10, %v361_v7 }
  0x76   : > { %966 = vmatpush1.bf16.msra.mxu1 %v965_v34  ;;  %v308_v16 = vld [vmem:[%s1700_s0 + $0x8] sm:$0xff]  ;;  %v432_v18 = vld [vmem:[%s1470_s7 + $0x398] sm:$0xff]  ;;  %v1045_v21 = vpack.c.bf16 %v427_v12, %v425_v11  ;;  %v983_v22 = vpack.c.bf16 %v368_v15, %v366_v14  ;;  %v365_v23 = vld [vmem:[%s1470_s7 + $0x180] sm:$0xff] }
  0x77   : > { %1030 = vmatpush1.bf16.msra.mxu0 %v1029_v35  ;;  %968 = vmatprep.subr.bf16.mxu1 %v967_v36  ;;  %v430_v17 = vld [vmem:[%s1470_s7 + $0x388] sm:$0xff]  ;;  %v310_v19 = vld [vmem:[%s1700_s0 + $0x18] sm:$0xff]  ;;  %v367_v24 = vld [vmem:[%s1470_s7 + $0x190] sm:$0xff] }
  0x78   : > { %1032 = vmatprep.subr.bf16.mxu0 %v1031_v40  ;;  %541 = vmatprep.mubr.f32.mxu1 %v308_v16  ;;  %v429_v25 = vld [vmem:[%s1470_s7 + $0x380] sm:$0xff]  ;;  %v1047_v26 = vpack.c.bf16 %v432_v18, %v430_v17  ;;  %v431_v27 = vld [vmem:[%s1470_s7 + $0x390] sm:$0xff]  ;;  %v370_v28 = vld [vmem:[%s1470_s7 + $0x1a8] sm:$0xff]  ;;  %v985_v32 = vpack.c.bf16 %v367_v24, %v365_v23 }
  0x79   : > { %618 = vmatprep.mubr.f32.mxu0 %v310_v19  ;;  %v372_v29 = vld [vmem:[%s1470_s7 + $0x1b8] sm:$0xff]  ;;  %v434_v30 = vld [vmem:[%s1470_s7 + $0x3a8] sm:$0xff]  ;;  %v1049_v33 = vpack.c.bf16 %v431_v27, %v429_v25  ;;  %v369_v35 = vld [vmem:[%s1470_s7 + $0x1a0] sm:$0xff] }
  0x7a   : > { %970 = vmatpush1.bf16.msra.mxu1 %v969_v46  ;;  %v436_v31 = vld [vmem:[%s1470_s7 + $0x3b8] sm:$0xff]  ;;  %v987_v34 = vpack.c.bf16 %v372_v29, %v370_v28  ;;  %v371_v36 = vld [vmem:[%s1470_s7 + $0x1b0] sm:$0xff]  ;;  %v433_v37 = vld [vmem:[%s1470_s7 + $0x3a0] sm:$0xff] }
  0x7b   : > { %1034 = vmatpush1.bf16.msra.mxu0 %v1033_v47  ;;  %972 = vmatprep.subr.bf16.mxu1 %v971_v48  ;;  %v1051_v38 = vpack.c.bf16 %v436_v31, %v434_v30  ;;  %v435_v39 = vld [vmem:[%s1470_s7 + $0x3b0] sm:$0xff]  ;;  %v374_v40 = vld [vmem:[%s1470_s7 + $0x1c8] sm:$0xff]  ;;  %v376_v41 = vld [vmem:[%s1470_s7 + $0x1d8] sm:$0xff]  ;;  %v989_v44 = vpack.c.bf16 %v371_v36, %v369_v35 }
  0x7c   : > { %1036 = vmatprep.subr.bf16.mxu0 %v1035_v52  ;;  %v438_v42 = vld [vmem:[%s1470_s7 + $0x3c8] sm:$0xff]  ;;  %v440_v43 = vld [vmem:[%s1470_s7 + $0x3d8] sm:$0xff]  ;;  %v1053_v45 = vpack.c.bf16 %v435_v39, %v433_v37  ;;  %v991_v46 = vpack.c.bf16 %v376_v41, %v374_v40  ;;  %v373_v47 = vld [vmem:[%s1470_s7 + $0x1c0] sm:$0xff] }
  0x7d   : > { %v375_v48 = vld [vmem:[%s1470_s7 + $0x1d0] sm:$0xff]  ;;  %v437_v49 = vld [vmem:[%s1470_s7 + $0x3c0] sm:$0xff]  ;;  %v1055_v50 = vpack.c.bf16 %v440_v43, %v438_v42  ;;  %v378_v52 = vld [vmem:[%s1470_s7 + $0x1e8] sm:$0xff] }
  0x7e   : > { %974 = vmatpush1.bf16.msra.mxu1 %v973_v58  ;;  %v439_v51 = vld [vmem:[%s1470_s7 + $0x3d0] sm:$0xff]  ;;  %v380_v53 = vld [vmem:[%s1470_s7 + $0x1f8] sm:$0xff]  ;;  %v442_v54 = vld [vmem:[%s1470_s7 + $0x3e8] sm:$0xff]  ;;  %v993_v56 = vpack.c.bf16 %v375_v48, %v373_v47 }
  0x7f   : > { %1038 = vmatpush1.bf16.msra.mxu0 %v1037_v59  ;;  %976 = vmatprep.subr.bf16.mxu1 %v975_v60  ;;  %v444_v55 = vld [vmem:[%s1470_s7 + $0x3f8] sm:$0xff]  ;;  %v1057_v57 = vpack.c.bf16 %v439_v51, %v437_v49  ;;  %v995_v58 = vpack.c.bf16 %v380_v53, %v378_v52  ;;  %v377_v59 = vld [vmem:[%s1470_s7 + $0x1e0] sm:$0xff]  ;;  %v379_v60 = vld [vmem:[%s1470_s7 + $0x1f0] sm:$0xff] }
  0x80   : > { %1040 = vmatprep.subr.bf16.mxu0 %v1039_v0  ;;  %v441_v61 = vld [vmem:[%s1470_s7 + $0x3e0] sm:$0xff]  ;;  %v1059_v62 = vpack.c.bf16 %v444_v55, %v442_v54  ;;  %v443_v63 = vld [vmem:[%s1470_s7 + $0x3f0] sm:$0xff]  ;;  %v446_v0 = vld [vmem:[%s1470_s7 + $0x408] sm:$0xff]  ;;  %v997_v2 = vpack.c.bf16 %v379_v60, %v377_v59 }
  0x81   : > { %v448_v1 = vld [vmem:[%s1470_s7 + $0x418] sm:$0xff]  ;;  %v1061_v3 = vpack.c.bf16 %v443_v63, %v441_v61  ;;  %v445_v5 = vld [vmem:[%s1470_s7 + $0x400] sm:$0xff]  ;;  %v450_v7 = vld [vmem:[%s1470_s7 + $0x428] sm:$0xff] }
  0x82   : > { %978 = vmatpush1.bf16.msra.mxu1 %v977_v6  ;;  %v1063_v4 = vpack.c.bf16 %v448_v1, %v446_v0  ;;  %v447_v6 = vld [vmem:[%s1470_s7 + $0x410] sm:$0xff]  ;;  %v454_v15 = vld [vmem:[%s1470_s7 + $0x448] sm:$0xff]  ;;  %v456_v16 = vld [vmem:[%s1470_s7 + $0x458] sm:$0xff] }
  0x83   : > { %1042 = vmatpush1.bf16.msra.mxu0 %v1041_v8  ;;  %980 = vmatprep.subr.bf16.mxu1 %v979_v9  ;;  %v452_v8 = vld [vmem:[%s1470_s7 + $0x438] sm:$0xff]  ;;  %v307_v9 = vld [vmem:[%s1700_s0] sm:$0xff]  ;;  %v1065_v10 = vpack.c.bf16 %v447_v6, %v445_v5  ;;  %v309_v11 = vld [vmem:[%s1700_s0 + $0x10] sm:$0xff] }
  0x84   : > { %1044 = vmatprep.subr.bf16.mxu0 %v1043_v13  ;;  %v1067_v12 = vpack.c.bf16 %v452_v8, %v450_v7  ;;  %v449_v13 = vld [vmem:[%s1470_s7 + $0x420] sm:$0xff]  ;;  %v451_v14 = vld [vmem:[%s1470_s7 + $0x430] sm:$0xff]  ;;  %v314_v24 = vld [vmem:[%s1700_s0 + $0x38] sm:$0xff] }
  0x85   : > { %v313_v17 = vld [vmem:[%s1700_s0 + $0x30] sm:$0xff]  ;;  %v1069_v18 = vpack.c.bf16 %v451_v14, %v449_v13  ;;  %v315_v19 = vld [vmem:[%s1700_s0 + $0x40] sm:$0xff]  ;;  %v458_v25 = vld [vmem:[%s1470_s7 + $0x468] sm:$0xff] }
  0x86   : > { %982 = vmatpush1.bf16.msra.mxu1 %v981_v20  ;;  %v312_v20 = vld [vmem:[%s1700_s0 + $0x28] sm:$0xff]  ;;  %v455_v23 = vld [vmem:[%s1470_s7 + $0x450] sm:$0xff]  ;;  %v457_v29 = vld [vmem:[%s1470_s7 + $0x460] sm:$0xff] }
  0x87   : > { %1046 = vmatpush1.bf16.msra.mxu0 %v1045_v21  ;;  %984 = vmatprep.subr.bf16.mxu1 %v983_v22  ;;  %v1071_v21 = vpack.c.bf16 %v456_v16, %v454_v15  ;;  %v453_v22 = vld [vmem:[%s1470_s7 + $0x440] sm:$0xff]  ;;  %v459_v30 = vld [vmem:[%s1470_s7 + $0x470] sm:$0xff]  ;;  %v462_v31 = vld [vmem:[%s1470_s7 + $0x488] sm:$0xff] }
  0x88   : > { %1048 = vmatprep.subr.bf16.mxu0 %v1047_v26  ;;  %v460_v26 = vld [vmem:[%s1470_s7 + $0x478] sm:$0xff]  ;;  %v1073_v27 = vpack.c.bf16 %v455_v23, %v453_v22  ;;  %v461_v36 = vld [vmem:[%s1470_s7 + $0x480] sm:$0xff]  ;;  %v463_v37 = vld [vmem:[%s1470_s7 + $0x490] sm:$0xff] }
  0x89   : > { %v1075_v28 = vpack.c.bf16 %v460_v26, %v458_v25  ;;  %v468_v39 = vld [vmem:[%s1470_s7 + $0x4b8] sm:$0xff]  ;;  %v1081_v40 = vpack.c.bf16 %v463_v37, %v461_v36  ;;  %v465_v42 = vld [vmem:[%s1470_s7 + $0x4a0] sm:$0xff]  ;;  %v467_v43 = vld [vmem:[%s1470_s7 + $0x4b0] sm:$0xff] }
  0x8a   : > { %986 = vmatpush1.bf16.msra.mxu1 %v985_v32  ;;  %v464_v32 = vld [vmem:[%s1470_s7 + $0x498] sm:$0xff]  ;;  %v469_v48 = vld [vmem:[%s1470_s7 + $0x4c0] sm:$0xff]  ;;  %v471_v49 = vld [vmem:[%s1470_s7 + $0x4d0] sm:$0xff] }
  0x8b   : > { %1050 = vmatpush1.bf16.msra.mxu0 %v1049_v33  ;;  %988 = vmatprep.subr.bf16.mxu1 %v987_v34  ;;  %v1306_v33 = vmov 0.0   ;;  %v1077_v34 = vpack.c.bf16 %v459_v30, %v457_v29  ;;  %v1079_v35 = vpack.c.bf16 %v464_v32, %v462_v31  ;;  %v476_v51 = vld [vmem:[%s1470_s7 + $0x4f8] sm:$0xff]  ;;  %v1089_v52 = vpack.c.bf16 %v471_v49, %v469_v48  ;;  %v473_v54 = vld [vmem:[%s1470_s7 + $0x4e0] sm:$0xff]  ;;  %v475_v55 = vld [vmem:[%s1470_s7 + $0x4f0] sm:$0xff] }
  0x8c   : > { %1052 = vmatprep.subr.bf16.mxu0 %v1051_v38  ;;  %v466_v38 = vld [vmem:[%s1470_s7 + $0x4a8] sm:$0xff]  ;;  %v723_v6 = vld [vmem:[%s1478_s20] sm:$0x3] }
  0x8d   : > { %v1083_v41 = vpack.c.bf16 %v468_v39, %v466_v38 }
  0x8e   : > { %990 = vmatpush1.bf16.msra.mxu1 %v989_v44  ;;  %v470_v44 = vld [vmem:[%s1470_s7 + $0x4c8] sm:$0xff] }
  0x8f   : > { %1054 = vmatpush1.bf16.msra.mxu0 %v1053_v45  ;;  %992 = vmatprep.subr.bf16.mxu1 %v991_v46  ;;  %v472_v45 = vld [vmem:[%s1470_s7 + $0x4d8] sm:$0xff]  ;;  %v1085_v46 = vpack.c.bf16 %v467_v43, %v465_v42 }
  0x90   : > { %1056 = vmatprep.subr.bf16.mxu0 %v1055_v50  ;;  %v1087_v47 = vpack.c.bf16 %v472_v45, %v470_v44  ;;  %v474_v50 = vld [vmem:[%s1470_s7 + $0x4e8] sm:$0xff]  ;;  %s926_s7 = sshll.u32 %s1466_s12, 5  ;;  %s934_s12 = sshll.u32 (%p1713_p11), %s1291_s15, 4 }
  0x91   : > { %v1091_v53 = vpack.c.bf16 %v476_v51, %v474_v50  ;;  %s277_s20 = scalar_lea.vmem [#allocation6], %s926_s7  ;;  %s767_s29 = scalar_lea.vmem (%p1713_p11), %s1703_s3, %s934_s12 }
  0x92   : > { %994 = vmatpush1.bf16.msra.mxu1 %v993_v56  ;;  %v1093_v56 = vpack.c.bf16 %v475_v55, %v473_v54 }
  0x93   : > { %1058 = vmatpush1.bf16.msra.mxu0 %v1057_v57  ;;  %996 = vmatprep.subr.bf16.mxu1 %v995_v58  ;;  %v316_v57 = vld [vmem:[%s1700_s0 + $0x48] sm:$0xff]  ;;  %v311_v58 = vld [vmem:[%s1700_s0 + $0x20] sm:$0xff] }
  0x94   : > { %1060 = vmatprep.subr.bf16.mxu0 %v1059_v62 }
  0x96   : > { %998 = vmatpush1.bf16.msra.mxu1 %v997_v2 }
  0x97   : > { %1062 = vmatpush1.bf16.msra.mxu0 %v1061_v3  ;;  %1095 = vmatprep.subr.bf16.mxu1 %v1063_v4  ;;  %v725_v3 = vlaneseq }
  0x98   : > { %1064 = vmatprep.subr.bf16.mxu0 %v1063_v4 }
  0x99   : > { %542 = vmatmul.mubr.f32.vlgmr.msra.gmra.mrb[0].mxu1 %v307_v9  ;;  %v726_v4 = vshrl.u32 %v725_v3, 7 }
  0x9a   : > { %619 = vmatmul.mubr.f32.vlgmr.msra.gmra.mrb[0].mxu0 %v309_v11  ;;  %1103 = vmatpush1.bf16.msra.mxu1 %v1065_v10 }
  0x9b   : > { %1066 = vmatpush1.bf16.msra.mxu0 %v1065_v10  ;;  %1096 = vmatprep.subr.bf16.mxu1 %v1067_v12  ;;  %v727_v5 = vsub.s32 0, %v726_v4  ;;  %v731_v7 = vsub.s32 1, %v726_v4 }
  0x9c   : > { %1068 = vmatprep.subr.bf16.mxu0 %v1067_v12  ;;  %547 = vmatprep.mubr.f32.mxu1 %v313_v17 }
  0x9d   : > { %624 = vmatprep.mubr.f32.mxu0 %v315_v19  ;;  %548 = vmatmul.mubr.f32.gmra.mrb[2].mxu1 %v312_v20  ;;  %v728_v10 = vrot.slane %v723_v6, %v727_v5  ;;  %v732_v15 = vrot.slane %v723_v6, %v731_v7 }
  0x9e   : > { %1104 = vmatpush1.bf16.msra.mxu1 %v1069_v18  ;;  %625 = vmatmul.mubr.f32.gmra.mrb[2].mxu0 %v314_v24 }
  0x9f   : > { %1070 = vmatpush1.bf16.msra.mxu0 %v1069_v18  ;;  %1097 = vmatprep.subr.bf16.mxu1 %v1071_v21 }
  0xa0   : > { %1072 = vmatprep.subr.bf16.mxu0 %v1071_v21  ;;  %695 = vmatprep.mubr.f32.mxu0 %v1306_v33 }
  0xa1   : > { %701 = vmatprep.mubr.f32.mxu1 %v1306_v33 }
  0xa2   : > { %1105 = vmatpush1.bf16.msra.mxu1 %v1073_v27 }
  0xa3   : > { %1074 = vmatpush1.bf16.msra.mxu0 %v1073_v27  ;;  %1098 = vmatprep.subr.bf16.mxu1 %v1075_v28 }
  0xa4   : > { %1076 = vmatprep.subr.bf16.mxu0 %v1075_v28 }
  0xa6   : > { %1106 = vmatpush1.bf16.msra.mxu1 %v1077_v34 }
  0xa7   : > { %1078 = vmatpush1.bf16.msra.mxu0 %v1077_v34  ;;  %1099 = vmatprep.subr.bf16.mxu1 %v1079_v35 }
  0xa8   : > { %1080 = vmatprep.subr.bf16.mxu0 %v1079_v35 }
  0xaa   : > { %1107 = vmatpush1.bf16.msra.mxu1 %v1081_v40 }
  0xab   : > { %1082 = vmatpush1.bf16.msra.mxu0 %v1081_v40  ;;  %1100 = vmatprep.subr.bf16.mxu1 %v1083_v41 }
  0xac   : > { %1084 = vmatprep.subr.bf16.mxu0 %v1083_v41 }
  0xae   : > { %1108 = vmatpush1.bf16.msra.mxu1 %v1085_v46 }
  0xaf   : > { %1086 = vmatpush1.bf16.msra.mxu0 %v1085_v46  ;;  %1101 = vmatprep.subr.bf16.mxu1 %v1087_v47 }
  0xb0   : > { %1088 = vmatprep.subr.bf16.mxu0 %v1087_v47 }
  0xb2   : > { %1109 = vmatpush1.bf16.msra.mxu1 %v1089_v52 }
  0xb3   : > { %1090 = vmatpush1.bf16.msra.mxu0 %v1089_v52  ;;  %1102 = vmatprep.subr.bf16.mxu1 %v1091_v53 }
  0xb4   : > { %1092 = vmatprep.subr.bf16.mxu0 %v1091_v53 }
  0xb6   : > { %1110 = vmatpush1.bf16.msra.mxu1 %v1093_v56 }
  0xb7   : > { %1094 = vmatpush1.bf16.msra.mxu0 %v1093_v56 }
  0xb9   : > { %702 = vmatmul.mubr.f32.vlgmr.msra.gmra.mrb[4].mxu1 %v316_v57 }
  0xba   : > { %696 = vmatmul.mubr.f32.vlgmr.msra.gmra.mrb[0].mxu0 %v311_v58 }
 0x16c   : > { %v543_v59 = vpop.f32.mrb[0].mxu1 }
 0x16d   : > { %v545_v60 = vpop.f32.mrb[1].mxu1 }
 0x170   : > { %v549_v61 = vpop.f32.mrb[2].mxu1 }
 0x171   : > { %v626_v62 = vpop.f32.mrb[2].mxu0  ;;  %v551_v63 = vpop.f32.mrb[3].mxu1 }
 0x172   : > { %v627_v0 = vadd.f32 %v626_v62, %v549_v61  ;;  %v628_v1 = vpop.f32.mrb[3].mxu0 }
 0x173   : > { %v629_v2 = vadd.f32 %v628_v1, %v551_v63 }
 0x18c   : > { %v703_v8 = vpop.f32.mrb[4].mxu1 }
 0x18d   : > { %v697_v9 = vpop.f32.mrb[0].mxu0  ;;  %v704_v11 = vadd.f32 %v703_v8, %v627_v0  ;;  %v705_v12 = vpop.f32.mrb[5].mxu1 }
 0x18e   : > { %v1111_v13 = vadd.f32 %v697_v9, %v543_v59  ;;  %v699_v14 = vpop.f32.mrb[1].mxu0  ;;  %v706_v16 = vadd.f32 %v705_v12, %v629_v2 }
 0x18f   : > { %v1112_v17 = vadd.f32 %v699_v14, %v545_v60  ;;  %v737_v18 = vadd.f32 %v728_v10, %v704_v11 }
 0x190   : > { %v735_v19 = vadd.f32 %v1111_v13, %v728_v10  ;;  %v738_v20 = vadd.f32 %v732_v15, %v706_v16  ;;  %761 = sbr.rel (!%p1713_p11) target bundleno = 415 (0x19f), region = 52 }
 0x191   : > { %vm741_vm0 = vcmp.ge.f32.partialorder %v737_v18, 0.0  ;;  %v745_v21 = vmul.f32 0.1, %v737_v18  ;;  %v736_v22 = vadd.f32 %v1112_v17, %v732_v15 }
 0x192   : > { %vm739_vm1 = vcmp.ge.f32.partialorder %v735_v19, 0.0  ;;  %v743_v23 = vmul.f32 0.1, %v735_v19  ;;  %vm742_vm2 = vcmp.ge.f32.partialorder %v738_v20, 0.0  ;;  %v746_v24 = vmul.f32 0.1, %v738_v20 }
 0x193   : > { %v749_v25 = vsel %vm741_vm0, %v737_v18, %v745_v21  ;;  %vm740_vm3 = vcmp.ge.f32.partialorder %v736_v22, 0.0  ;;  %v744_v26 = vmul.f32 0.1, %v736_v22 }
 0x194   : > { %v747_v27 = vsel %vm739_vm1, %v735_v19, %v743_v23  ;;  %753 = vst [vmem:[%s277_s20 + $0x10] sm:$0xff] %v749_v25  ;;  %v750_v28 = vsel %vm742_vm2, %v738_v20, %v746_v24 }
 0x195   : > { %751 = vst [vmem:[%s277_s20] sm:$0xff] %v747_v27  ;;  %v748_v29 = vsel %vm740_vm3, %v736_v22, %v744_v26  ;;  %754 = vst [vmem:[%s277_s20 + $0x18] sm:$0xff] %v750_v28 }
 0x196   : > { %752 = vst [vmem:[%s277_s20 + $0x8] sm:$0xff] %v748_v29 }
 0x19b   : > { %v784_v32 = vld [vmem:[%s277_s20 + $0x10] sm:$0xff] }
 0x19c   : > { %v780_v30 = vld [vmem:[%s277_s20] sm:$0xff]  ;;  %v786_v33 = vld [vmem:[%s277_s20 + $0x18] sm:$0xff]  ;;  %785 = vst [vmem:[%s767_s29 + $0x20] sm:$0xff] %v784_v32 }
 0x19d   : > { %v782_v31 = vld [vmem:[%s277_s20 + $0x8] sm:$0xff]  ;;  %781 = vst [vmem:[%s767_s29] sm:$0xff] %v780_v30  ;;  %787 = vst [vmem:[%s767_s29 + $0x28] sm:$0xff] %v786_v33 }
 0x19e   : > { %783 = vst [vmem:[%s767_s29 + $0x8] sm:$0xff] %v782_v31 }
 0x19f PF: > { %s19_s17 = sadd.s32 1, %s1299_s17   ;;  %s1714_s12 = smov %s1283_s13 }
 0x1a0   : > { %p16_p0 = scmp.ge.s32.totalorder %s19_s17, 4   ;;  %s1715_s13 = smov %s1287_s14 }
 0x1a1   : > { %s1716_s14 = smov %s1375_s24  ;;  %s1717_s15 = smov %s1295_s16 }
 0x1a2   : > { %s1718_s16 = smov %s1720_s19  ;;  %18 = sbr.rel (!%p16_p0) target bundleno = 6 (0x6), region = 119 }
 0x1a9   :  { %803 = vsyncpa [#allocation3], 1 }
 0x1aa   :  { %805 = vsyncpa [#allocation3 + $0x1], 1 }
 0x1ab   :  { %806 = vsyncpa [#allocation5], 1 }
 0x1ac   :  { %808 = vsyncpa [#allocation5 + $0x1], 1 }

// kernel: pd_forward.6
= control target key start
LH: loop header
LB: loop body
LE: loop exit
PB: predicated region body
PF: predicated region fallthrough
CT: control target
= control target key end

     0   :  { %s1624_s0 = inlined_call_operand.vmem [shape: f32[8,2560], index: 0, kind: input, shape index: {}]   ;;  %s1625_s1 = inlined_call_operand.hbm [shape: f32[2560,1024], index: 1, kind: input, shape index: {}]   ;;  %s1626_s2 = inlined_call_operand.hbm [shape: f32[1,1024], index: 2, kind: input, shape index: {}]   ;;  %s1627_s3 = inlined_call_operand.vmem [shape: f32[8,1024], index: 3, kind: output, shape index: {}]  }
   0x1   :  { %1633 = sst [smem:[#allocation9_spill]] %s1625_s1 }
   0x2   :  { %8 = vsyncpa [#allocation3], 0 }
   0x3   :  { %10 = vsyncpa [#allocation3 + $0x1], 0 }
   0x4   :  { %11 = vsyncpa [#allocation5], 0 }
   0x5   :  { %13 = vsyncpa [#allocation5 + $0x1], 0  ;;  %s1200_s12 = smov 0   ;;  %s1202_s13 = smov 0  }
   0x6   :  { %s1204_s14 = smov 0   ;;  %s1206_s15 = smov 0  }
   0x7   :  { %s1208_s16 = smov 0   ;;  %s1210_s17 = smov 0  }
   0x8   :  { %s1212_s18 = smov 0   ;;  %s1214_s19 = smov 0  }
   0x9   :  { %s1216_s20 = smov 0   ;;  %s1218_s21 = smov 0  }
   0xa   :  { %s1220_s22 = smov 0  }
   0xb LB: > { %s31_s23 = sadd.s32 1, %s1164_s20  ;;  %s75_s24 = sadd.s32 1, %s1152_s17  ;;  %s1172_s22 = sphi %s1220_s22, %s19_s22   ;;  %s1168_s21 = sphi %s1218_s21, %s1659_s21   ;;  %s1164_s20 = sphi %s1216_s20, %s1658_s20   ;;  %s1160_s19 = sphi %s1214_s19, %s1657_s19   ;;  %s1156_s18 = sphi %s1212_s18, %s1656_s18   ;;  %s1152_s17 = sphi %s1210_s17, %s1655_s17   ;;  %s1148_s16 = sphi %s1208_s16, %s1654_s16   ;;  %s1144_s15 = sphi %s1206_s15, %s1653_s15   ;;  %s1140_s14 = sphi %s1204_s14, %s1652_s14   ;;  %s1136_s13 = sphi %s1202_s13, %s1651_s13   ;;  %s1132_s12 = sphi %s1200_s12, %s1650_s12  }
   0xc   : > { %p1257_p0 = scmp.ge.s32.totalorder %s31_s23, 5  ;;  %p82_p1 = scmp.ne.s32.totalorder %s1152_s17, %s1148_s16 }
   0xd   : > { %p1629_p2 = scmp.eq.s32.totalorder %s1172_s22, 0  ;;  %p1628_p4 = scmp.lt.s32.totalorder %s1172_s22, 20 }
   0xe   : > { %s1661_s23 = smov (%p1257_p0, %s31_s23), 0  ;;  %s179_s27 = sand.u32 1, %s1152_s17  }
   0xf   : > { %p84_p3 = por %p1629_p2, %p82_p1  ;;  %s70_s26 = ssub.s32 %s1164_s20, %s1661_s23 }
  0x10   : > { %s763_s28 = sshll.u32 %s179_s27, 10  ;;  %s765_s29 = sshll.u32 %s1168_s21, 1 }
  0x11   : > { %s782_s30 = sshll.u32 %s1164_s20, 9  ;;  %s183_s4 = scalar_lea.vmem [#allocation2], %s763_s28 }
  0x12   : > { %s193_s5 = sshll.u32 %s183_s4, 4  ;;  %s190_s6 = sadd.s32 %s782_s30, %s765_s29  ;;  %s1276_s5 = int_to_ptr.vmem [resolvable:$true] %s193_s5 }
  0x13   : > { %s767_s7 = sshll.u32 %s190_s6, 7  ;;  %p1280_p5 = pnand %p1628_p4, %p84_p3 }
  0x14   : > { %s1636_s1 = sld [smem:[#allocation9_spill]]  ;;  %s1290_s28 = scalar_lea.sflag [#allocation3], %s179_s27 }
  0x15   : > { %p1020_p8 = pneg %p1280_p5 }
  0x1a   : > { %s1287_s11 = scalar_lea.hbm %s1636_s1, %s767_s7  ;;  %s1023_s6 = scalar_lea.hbm %s1636_s1, 327680 }
  0x1b   : > { %s1018_s29 = scalar_lea.hbm %s1287_s11, 16384  ;;  %p1024_p11 = scmp.lt.u32.totalorder %s1287_s11, %s1636_s1 }
  0x1c   : > { %p1019_p7 = scmp.ne.s32.totalorder %s1287_s11, %s1018_s29  ;;  %p1025_p12 = scmp.lt.u32.totalorder %s1023_s6, %s1018_s29 }
  0x1d   : > { %p1027_p1 = scmp.lt.u32.totalorder %s1018_s29, %s1287_s11 }
  0x1e   : > { %p1021_p9 = pnand %p1020_p8, %p1019_p7  ;;  %p1026_p13 = por %p1025_p12, %p1024_p11 }
  0x20   : > { %p1022_p10 = pneg %p1021_p9  ;;  %p1028_p3 = por %p1027_p1, %p1026_p13 }
  0x22   : > { %p1029_p4 = pnand %p1028_p3, %p1022_p10 }
  0x24   : > { %1032 = shalt.err (!%p1029_p4)
}
  0x25   : > { %s1033_s27 = scalar_lea.vmem %s1276_s5, 16384  ;;  %s1174_s10 = smov [#allocation2]  }
  0x26   : > { %p1034_p7 = scmp.ne.s32.totalorder %s1276_s5, %s1033_s27  ;;  %s1038_s30 = sshll.u32 %s1174_s10, 4  ;;  %s1039_s30 = int_to_ptr.vmem [resolvable:$false] %s1038_s30 }
  0x27   : > { %s1040_s4 = scalar_lea.vmem %s1039_s30, 32768  ;;  %p1041_p6 = scmp.lt.s32.totalorder %s1276_s5, %s1039_s30 }
  0x28   : > { %p1036_p9 = pnand %p1034_p7, %p1020_p8  ;;  %p1042_p11 = scmp.lt.s32.totalorder %s1040_s4, %s1033_s27 }
  0x2a   : > { %p1037_p2 = pneg %p1036_p9  ;;  %p1043_p12 = por %p1042_p11, %p1041_p6 }
  0x2c   : > { %p1044_p13 = pnand %p1043_p12, %p1037_p2 }
  0x2e   : > { %1047 = shalt.err (!%p1044_p13)
}
  0x2f   : > { %s1175_s29 = smov 1024   ;;  %s1176_s6 = smov 256  }
  0x30   : > { %s1177_s7 = smov 16   ;;  %p220_p2 = scmp.lt.s32.totalorder %s1172_s22, 21 }
  0x31   : > { %921 = dma.hbm_to_vmem [thread:$0]  (!%p1280_p5), %s1287_s11, 16384, %s1276_s5, %s1290_s28, %s1175_s29, %s1176_s6, %s1177_s7  }
  0x32   : > { %p1637_p4 = scmp.ge.s32.totalorder %s1172_s22, 1  ;;  %s759_s27 = sadd.s32 4294967295, %s1172_s22  }
  0x33   : > { %s34_s10 = sadd.s32 1, %s1168_s21  ;;  %p88_p8 = scmp.ne.s32.totalorder %s1148_s16, %s1144_s15 }
  0x34   : > { %p1321_p6 = pnand %p1637_p4, %p220_p2  ;;  %s1663_s10 = smov (!%p1257_p0, %s34_s10), %s1168_s21 }
  0x35   : > { %p1332_p10 = scmp.eq.s32.totalorder %s759_s27, 0  ;;  %p36_p5 = scmp.ge.s32.totalorder %s1663_s10, 4 }
  0x36   : > { %s101_s5 = sadd.s32 1, %s1140_s14  ;;  %p108_p3 = scmp.ne.s32.totalorder %s1140_s14, %s1136_s13 }
  0x37   : > { %p1339_p1 = por %p1332_p10, %p88_p8  ;;  %s1665_s10 = smov (%p36_p5, %s1663_s10), 0 }
  0x38   : > { %1641 = sst [smem:[#allocation8_spill]] %s1665_s10  ;;  %p1642_p0 = scmp.eq.s32.totalorder %s1172_s22, 0 }
  0x39   : > { %s1640_s11 = scalar_select %p1339_p1, 1, 0 }
  0x3a   : > { %p1349_p7 = por %p108_p3, %p1642_p0  ;;  %p114_p9 = scmp.ne.s32.totalorder %s1136_s13, %s1132_s12 }
  0x3b   : > { %s71_s25 = ssub.s32 %s1168_s21, %s1665_s10  ;;  %s203_s28 = sand.u32 1, %s1140_s14  }
  0x3c   : > { %s72_s30 = sor.u32 %s71_s25, %s70_s26  ;;  %p99_p11 = scmp.eq.s32.totalorder %s71_s25, 0 }
  0x3d   : > { %p73_p12 = scmp.eq.s32.totalorder %s72_s30, 0  ;;  %p1363_p13 = por %p114_p9, %p1332_p10 }
  0x3e   : > { %s1368_s29 = scalar_select %p99_p11, %s1140_s14, %s101_s5  }
  0x3f   : > { %s1644_s4 = scalar_select %p1363_p13, 1, 0 }
  0x40   : > { %s1373_s6 = scalar_select %p73_p12, %s1152_s17, %s75_s24  }
  0x41   : > { %s768_s7 = sshll.u32 %s203_s28, 1  ;;  %s783_s27 = sshll.u32 %s1168_s21, 5 }
  0x42   : > { %s1379_s10 = scalar_lea.hbm %s1626_s2, %s783_s27  ;;  %s207_s26 = scalar_lea.vmem [#allocation4], %s768_s7 }
  0x43   : > { %s215_s8 = sshll.u32 %s207_s26, 4  ;;  %p1645_p2 = scmp.lt.s32.totalorder %s1172_s22, 20  ;;  %s1381_s8 = int_to_ptr.vmem [resolvable:$true] %s215_s8 }
  0x44   : > { %s204_s5 = scalar_lea.sflag [#allocation5], %s203_s28  ;;  %s1048_s1 = scalar_lea.hbm %s1379_s10, 32 }
  0x45   : > { %p1387_p4 = pnand %p1645_p2, %p1349_p7  ;;  %p1049_p8 = scmp.ne.s32.totalorder %s1379_s10, %s1048_s1 }
  0x46   : > { %s1053_s15 = scalar_lea.hbm %s1626_s2, 128  ;;  %p1054_p0 = scmp.lt.u32.totalorder %s1379_s10, %s1626_s2 }
  0x47   : > { %p1050_p10 = pneg %p1387_p4  ;;  %p1055_p7 = scmp.lt.u32.totalorder %s1053_s15, %s1048_s1 }
  0x48   : > { %p1057_p11 = scmp.lt.u32.totalorder %s1048_s1, %s1379_s10 }
  0x49   : > { %p1051_p5 = pnand %p1050_p10, %p1049_p8  ;;  %p1056_p9 = por %p1055_p7, %p1054_p0 }
  0x4b   : > { %p1052_p3 = pneg %p1051_p5  ;;  %p1058_p12 = por %p1057_p11, %p1056_p9 }
  0x4d   : > { %p1059_p2 = pnand %p1058_p12, %p1052_p3 }
  0x4f   : > { %1062 = shalt.err (!%p1059_p2)
}
  0x50   : > { %s1063_s28 = scalar_lea.vmem %s1381_s8, 32  ;;  %s1178_s12 = smov [#allocation4]  }
  0x51   : > { %p1064_p8 = scmp.ne.s32.totalorder %s1381_s8, %s1063_s28  ;;  %s1068_s26 = sshll.u32 %s1178_s12, 4  ;;  %s1069_s26 = int_to_ptr.vmem [resolvable:$false] %s1068_s26 }
  0x52   : > { %s1070_s25 = scalar_lea.vmem %s1069_s26, 64  ;;  %p1071_p1 = scmp.lt.s32.totalorder %s1381_s8, %s1069_s26 }
  0x53   : > { %p1066_p5 = pnand %p1064_p8, %p1050_p10  ;;  %p1072_p0 = scmp.lt.s32.totalorder %s1070_s25, %s1063_s28 }
  0x55   : > { %p1067_p13 = pneg %p1066_p5  ;;  %p1073_p7 = por %p1072_p0, %p1071_p1 }
  0x57   : > { %p1074_p9 = pnand %p1073_p7, %p1067_p13 }
  0x59   : > { %1077 = shalt.err (!%p1074_p9)
}
  0x5a   : > { %924 = dma.hbm_to_vmem [thread:$0]  (!%p1387_p4), %s1379_s10, 32, %s1381_s8, %s204_s5  }
  0x5b   : > { %224 = sbr.rel (%p1321_p6) target bundleno = 415 (0x19f), region = 32  ;;  %s226_s1 = sand.u32 (!%p1321_p6), 1, %s1148_s16  }
  0x5c   : > { %s772_s30 = sshll.u32 (!%p1321_p6), %s226_s1, 10  ;;  %s227_s15 = scalar_lea.sflag (!%p1321_p6), [#allocation3], %s226_s1 }
  0x5d   : > { %s1419_s7 = scalar_lea.vmem (!%p1321_p6), [#allocation2], %s772_s30  ;;  %p1647_p10 = scmp.ne.s32.totalorder (!%p1321_p6), %s1640_s11, 0 }
  0x62   : > { %1123 = dma.done.wait (%p1647_p10), %s227_s15, 16384  }
  0x63   : > { %1125 = vsyncadd (%p1647_p10), %s227_s15, 4294950912  ;;  %s235_s24 = sand.u32 1, %s1136_s13   ;;  %p1648_p6 = scmp.ne.s32.totalorder %s1644_s4, 0 }
  0x64   : > { %s1426_s27 = sshll.u32 %s235_s24, 1  ;;  %s236_s9 = scalar_lea.sflag [#allocation5], %s235_s24 }
  0x65   : > { %s239_s10 = scalar_lea.vmem [#allocation4], %s1426_s27 }
  0x66   : > { %1127 = dma.done.wait (%p1648_p6), %s236_s9, 32  }
  0x67   : > { %1129 = vsyncadd (%p1648_p6), %s236_s9, 4294967264  ;;  %s774_s8 = sshll.u32 %s1156_s18, 2  ;;  %s776_s5 = sshll.u32 %s1160_s19, 1 }
  0x68   : > { %p283_p1 = scmp.lt.s32.totalorder %s774_s8, 19  ;;  %p296_p13 = scmp.lt.s32.totalorder %s776_s5, 7 }
  0x69   : > { %p778_p4 = scmp.ne.s32.totalorder %s1156_s18, 0 }
  0x6a   : > { %s1667_s8 = smov (!%p283_p1, %s774_s8), 19  ;;  %s1669_s5 = smov (!%p296_p13, %s776_s5), 7 }
  0x6b   : > { %s775_s11 = sshll.u32 %s1667_s8, 3  ;;  %s777_s25 = sshll.u32 %s1669_s5, 3  ;;  %v1179_v0 = vmov (!%p778_p4), 0.0  }
  0x6c   : > { %s1438_s26 = scalar_lea.vmem %s1624_s0, %s775_s11  ;;  %s1443_s4 = scalar_lea.vmem %s1627_s3, %s777_s25 }
  0x6d   : > { %306 = sbr.rel (%p778_p4) target bundleno = 116 (0x74), region = 44  ;;  %307 = vst [vmem:[%s1443_s4] sm:$0xff] (!%p778_p4), %v1179_v0  ;;  %308 = vst [vmem:[%s1443_s4 + $0x8] sm:$0xff] (!%p778_p4), %v1179_v0 }
  0x74 PF: > { %v316_v1 = vld [vmem:[%s1419_s7 + $0x8] sm:$0xff]  ;;  %v318_v2 = vld [vmem:[%s1419_s7 + $0x18] sm:$0xff]  ;;  %v315_v6 = vld [vmem:[%s1419_s7] sm:$0xff]  ;;  %p779_p3 = scmp.ne.s32.totalorder %s1156_s18, 4 }
  0x75   : > { %v380_v3 = vld [vmem:[%s1419_s7 + $0x208] sm:$0xff]  ;;  %v784_v4 = vpack.c.bf16 %v318_v2, %v316_v1  ;;  %v382_v5 = vld [vmem:[%s1419_s7 + $0x218] sm:$0xff]  ;;  %v317_v7 = vld [vmem:[%s1419_s7 + $0x10] sm:$0xff] }
  0x76   : > { %v848_v8 = vpack.c.bf16 %v382_v5, %v380_v3  ;;  %v786_v9 = vpack.c.bf16 %v317_v7, %v315_v6  ;;  %v379_v10 = vld [vmem:[%s1419_s7 + $0x200] sm:$0xff]  ;;  %v381_v11 = vld [vmem:[%s1419_s7 + $0x210] sm:$0xff]  ;;  %v320_v12 = vld [vmem:[%s1419_s7 + $0x28] sm:$0xff] }
  0x77   : > { %785 = vmatprep.subr.bf16.mxu1 %v784_v4  ;;  %v850_v13 = vpack.c.bf16 %v381_v11, %v379_v10  ;;  %v322_v14 = vld [vmem:[%s1419_s7 + $0x38] sm:$0xff]  ;;  %v384_v15 = vld [vmem:[%s1419_s7 + $0x228] sm:$0xff]  ;;  %v319_v19 = vld [vmem:[%s1419_s7 + $0x20] sm:$0xff] }
  0x78   : > { %v386_v16 = vld [vmem:[%s1419_s7 + $0x238] sm:$0xff]  ;;  %849 = vmatprep.subr.bf16.mxu0 %v848_v8  ;;  %787 = vmatpush1.bf16.msra.mxu1 %v786_v9  ;;  %v788_v17 = vpack.c.bf16 %v322_v14, %v320_v12  ;;  %v321_v20 = vld [vmem:[%s1419_s7 + $0x30] sm:$0xff]  ;;  %v383_v21 = vld [vmem:[%s1419_s7 + $0x220] sm:$0xff] }
  0x79   : > { %v852_v18 = vpack.c.bf16 %v386_v16, %v384_v15  ;;  %851 = vmatpush1.bf16.msra.mxu0 %v850_v13  ;;  %v790_v22 = vpack.c.bf16 %v321_v20, %v319_v19  ;;  %v385_v23 = vld [vmem:[%s1419_s7 + $0x230] sm:$0xff]  ;;  %v324_v24 = vld [vmem:[%s1419_s7 + $0x48] sm:$0xff]  ;;  %v326_v25 = vld [vmem:[%s1419_s7 + $0x58] sm:$0xff] }
  0x7a   : > { %789 = vmatprep.subr.bf16.mxu1 %v788_v17  ;;  %v854_v26 = vpack.c.bf16 %v385_v23, %v383_v21  ;;  %v792_v27 = vpack.c.bf16 %v326_v25, %v324_v24  ;;  %v388_v28 = vld [vmem:[%s1419_s7 + $0x248] sm:$0xff]  ;;  %v390_v29 = vld [vmem:[%s1419_s7 + $0x258] sm:$0xff]  ;;  %v323_v30 = vld [vmem:[%s1419_s7 + $0x40] sm:$0xff] }
  0x7b   : > { %853 = vmatprep.subr.bf16.mxu0 %v852_v18  ;;  %v856_v31 = vpack.c.bf16 %v390_v29, %v388_v28  ;;  %v325_v32 = vld [vmem:[%s1419_s7 + $0x50] sm:$0xff]  ;;  %v387_v33 = vld [vmem:[%s1419_s7 + $0x240] sm:$0xff]  ;;  %v328_v36 = vld [vmem:[%s1419_s7 + $0x68] sm:$0xff] }
  0x7c   : > { %v389_v34 = vld [vmem:[%s1419_s7 + $0x250] sm:$0xff]  ;;  %791 = vmatpush1.bf16.msra.mxu1 %v790_v22  ;;  %v794_v35 = vpack.c.bf16 %v325_v32, %v323_v30  ;;  %v330_v37 = vld [vmem:[%s1419_s7 + $0x78] sm:$0xff]  ;;  %v392_v38 = vld [vmem:[%s1419_s7 + $0x268] sm:$0xff] }
  0x7d   : > { %855 = vmatpush1.bf16.msra.mxu0 %v854_v26  ;;  %793 = vmatprep.subr.bf16.mxu1 %v792_v27  ;;  %v858_v39 = vpack.c.bf16 %v389_v34, %v387_v33  ;;  %v796_v40 = vpack.c.bf16 %v330_v37, %v328_v36  ;;  %v394_v41 = vld [vmem:[%s1419_s7 + $0x278] sm:$0xff]  ;;  %v327_v42 = vld [vmem:[%s1419_s7 + $0x60] sm:$0xff]  ;;  %v329_v43 = vld [vmem:[%s1419_s7 + $0x70] sm:$0xff] }
  0x7e   : > { %857 = vmatprep.subr.bf16.mxu0 %v856_v31  ;;  %v860_v44 = vpack.c.bf16 %v394_v41, %v392_v38  ;;  %v391_v45 = vld [vmem:[%s1419_s7 + $0x260] sm:$0xff]  ;;  %v393_v46 = vld [vmem:[%s1419_s7 + $0x270] sm:$0xff]  ;;  %v332_v47 = vld [vmem:[%s1419_s7 + $0x88] sm:$0xff]  ;;  %v798_v51 = vpack.c.bf16 %v329_v43, %v327_v42 }
  0x7f   : > { %v334_v48 = vld [vmem:[%s1419_s7 + $0x98] sm:$0xff]  ;;  %v396_v49 = vld [vmem:[%s1419_s7 + $0x288] sm:$0xff]  ;;  %v862_v52 = vpack.c.bf16 %v393_v46, %v391_v45  ;;  %v331_v54 = vld [vmem:[%s1419_s7 + $0x80] sm:$0xff] }
  0x80   : > { %v398_v50 = vld [vmem:[%s1419_s7 + $0x298] sm:$0xff]  ;;  %795 = vmatpush1.bf16.msra.mxu1 %v794_v35  ;;  %v800_v53 = vpack.c.bf16 %v334_v48, %v332_v47  ;;  %v333_v55 = vld [vmem:[%s1419_s7 + $0x90] sm:$0xff]  ;;  %v395_v56 = vld [vmem:[%s1419_s7 + $0x280] sm:$0xff] }
  0x81   : > { %859 = vmatpush1.bf16.msra.mxu0 %v858_v39  ;;  %797 = vmatprep.subr.bf16.mxu1 %v796_v40  ;;  %v864_v57 = vpack.c.bf16 %v398_v50, %v396_v49  ;;  %v397_v58 = vld [vmem:[%s1419_s7 + $0x290] sm:$0xff]  ;;  %v336_v59 = vld [vmem:[%s1419_s7 + $0xa8] sm:$0xff]  ;;  %v338_v60 = vld [vmem:[%s1419_s7 + $0xb8] sm:$0xff]  ;;  %v802_v63 = vpack.c.bf16 %v333_v55, %v331_v54 }
  0x82   : > { %861 = vmatprep.subr.bf16.mxu0 %v860_v44  ;;  %v400_v61 = vld [vmem:[%s1419_s7 + $0x2a8] sm:$0xff]  ;;  %v402_v62 = vld [vmem:[%s1419_s7 + $0x2b8] sm:$0xff]  ;;  %v866_v0 = vpack.c.bf16 %v397_v58, %v395_v56  ;;  %v804_v1 = vpack.c.bf16 %v338_v60, %v336_v59  ;;  %v335_v2 = vld [vmem:[%s1419_s7 + $0xa0] sm:$0xff] }
  0x83   : > { %v337_v3 = vld [vmem:[%s1419_s7 + $0xb0] sm:$0xff]  ;;  %v399_v4 = vld [vmem:[%s1419_s7 + $0x2a0] sm:$0xff]  ;;  %v868_v5 = vpack.c.bf16 %v402_v62, %v400_v61  ;;  %v340_v7 = vld [vmem:[%s1419_s7 + $0xc8] sm:$0xff] }
  0x84   : > { %799 = vmatpush1.bf16.msra.mxu1 %v798_v51  ;;  %v401_v6 = vld [vmem:[%s1419_s7 + $0x2b0] sm:$0xff]  ;;  %v342_v8 = vld [vmem:[%s1419_s7 + $0xd8] sm:$0xff]  ;;  %v404_v9 = vld [vmem:[%s1419_s7 + $0x2c8] sm:$0xff]  ;;  %v806_v11 = vpack.c.bf16 %v337_v3, %v335_v2 }
  0x85   : > { %863 = vmatpush1.bf16.msra.mxu0 %v862_v52  ;;  %801 = vmatprep.subr.bf16.mxu1 %v800_v53  ;;  %v406_v10 = vld [vmem:[%s1419_s7 + $0x2d8] sm:$0xff]  ;;  %v870_v12 = vpack.c.bf16 %v401_v6, %v399_v4  ;;  %v808_v13 = vpack.c.bf16 %v342_v8, %v340_v7  ;;  %v339_v14 = vld [vmem:[%s1419_s7 + $0xc0] sm:$0xff]  ;;  %v341_v15 = vld [vmem:[%s1419_s7 + $0xd0] sm:$0xff] }
  0x86   : > { %865 = vmatprep.subr.bf16.mxu0 %v864_v57  ;;  %v403_v16 = vld [vmem:[%s1419_s7 + $0x2c0] sm:$0xff]  ;;  %v872_v17 = vpack.c.bf16 %v406_v10, %v404_v9  ;;  %v405_v18 = vld [vmem:[%s1419_s7 + $0x2d0] sm:$0xff]  ;;  %v344_v19 = vld [vmem:[%s1419_s7 + $0xe8] sm:$0xff]  ;;  %v810_v23 = vpack.c.bf16 %v341_v15, %v339_v14 }
  0x87   : > { %v346_v20 = vld [vmem:[%s1419_s7 + $0xf8] sm:$0xff]  ;;  %v408_v21 = vld [vmem:[%s1419_s7 + $0x2e8] sm:$0xff]  ;;  %v874_v24 = vpack.c.bf16 %v405_v18, %v403_v16  ;;  %v343_v26 = vld [vmem:[%s1419_s7 + $0xe0] sm:$0xff] }
  0x88   : > { %803 = vmatpush1.bf16.msra.mxu1 %v802_v63  ;;  %v410_v22 = vld [vmem:[%s1419_s7 + $0x2f8] sm:$0xff]  ;;  %v812_v25 = vpack.c.bf16 %v346_v20, %v344_v19  ;;  %v345_v27 = vld [vmem:[%s1419_s7 + $0xf0] sm:$0xff]  ;;  %v407_v28 = vld [vmem:[%s1419_s7 + $0x2e0] sm:$0xff] }
  0x89   : > { %867 = vmatpush1.bf16.msra.mxu0 %v866_v0  ;;  %805 = vmatprep.subr.bf16.mxu1 %v804_v1  ;;  %v876_v29 = vpack.c.bf16 %v410_v22, %v408_v21  ;;  %v409_v30 = vld [vmem:[%s1419_s7 + $0x2f0] sm:$0xff]  ;;  %v348_v31 = vld [vmem:[%s1419_s7 + $0x108] sm:$0xff]  ;;  %v350_v32 = vld [vmem:[%s1419_s7 + $0x118] sm:$0xff]  ;;  %v814_v35 = vpack.c.bf16 %v345_v27, %v343_v26 }
  0x8a   : > { %869 = vmatprep.subr.bf16.mxu0 %v868_v5  ;;  %v412_v33 = vld [vmem:[%s1419_s7 + $0x308] sm:$0xff]  ;;  %v414_v34 = vld [vmem:[%s1419_s7 + $0x318] sm:$0xff]  ;;  %v878_v36 = vpack.c.bf16 %v409_v30, %v407_v28  ;;  %v816_v37 = vpack.c.bf16 %v350_v32, %v348_v31  ;;  %v347_v38 = vld [vmem:[%s1419_s7 + $0x100] sm:$0xff] }
  0x8b   : > { %v349_v39 = vld [vmem:[%s1419_s7 + $0x110] sm:$0xff]  ;;  %v411_v40 = vld [vmem:[%s1419_s7 + $0x300] sm:$0xff]  ;;  %v880_v41 = vpack.c.bf16 %v414_v34, %v412_v33  ;;  %v352_v43 = vld [vmem:[%s1419_s7 + $0x128] sm:$0xff] }
  0x8c   : > { %807 = vmatpush1.bf16.msra.mxu1 %v806_v11  ;;  %v413_v42 = vld [vmem:[%s1419_s7 + $0x310] sm:$0xff]  ;;  %v354_v44 = vld [vmem:[%s1419_s7 + $0x138] sm:$0xff]  ;;  %v416_v45 = vld [vmem:[%s1419_s7 + $0x328] sm:$0xff]  ;;  %v818_v47 = vpack.c.bf16 %v349_v39, %v347_v38 }
  0x8d   : > { %871 = vmatpush1.bf16.msra.mxu0 %v870_v12  ;;  %809 = vmatprep.subr.bf16.mxu1 %v808_v13  ;;  %v418_v46 = vld [vmem:[%s1419_s7 + $0x338] sm:$0xff]  ;;  %v882_v48 = vpack.c.bf16 %v413_v42, %v411_v40  ;;  %v820_v49 = vpack.c.bf16 %v354_v44, %v352_v43  ;;  %v351_v50 = vld [vmem:[%s1419_s7 + $0x120] sm:$0xff]  ;;  %v353_v51 = vld [vmem:[%s1419_s7 + $0x130] sm:$0xff] }
  0x8e   : > { %873 = vmatprep.subr.bf16.mxu0 %v872_v17  ;;  %v415_v52 = vld [vmem:[%s1419_s7 + $0x320] sm:$0xff]  ;;  %v884_v53 = vpack.c.bf16 %v418_v46, %v416_v45  ;;  %v417_v54 = vld [vmem:[%s1419_s7 + $0x330] sm:$0xff]  ;;  %v356_v55 = vld [vmem:[%s1419_s7 + $0x148] sm:$0xff]  ;;  %v822_v59 = vpack.c.bf16 %v353_v51, %v351_v50 }
  0x8f   : > { %v358_v56 = vld [vmem:[%s1419_s7 + $0x158] sm:$0xff]  ;;  %v420_v57 = vld [vmem:[%s1419_s7 + $0x348] sm:$0xff]  ;;  %v886_v60 = vpack.c.bf16 %v417_v54, %v415_v52  ;;  %v355_v62 = vld [vmem:[%s1419_s7 + $0x140] sm:$0xff] }
  0x90   : > { %811 = vmatpush1.bf16.msra.mxu1 %v810_v23  ;;  %v422_v58 = vld [vmem:[%s1419_s7 + $0x358] sm:$0xff]  ;;  %v824_v61 = vpack.c.bf16 %v358_v56, %v356_v55  ;;  %v357_v63 = vld [vmem:[%s1419_s7 + $0x150] sm:$0xff]  ;;  %v419_v0 = vld [vmem:[%s1419_s7 + $0x340] sm:$0xff] }
  0x91   : > { %875 = vmatpush1.bf16.msra.mxu0 %v874_v24  ;;  %813 = vmatprep.subr.bf16.mxu1 %v812_v25  ;;  %v888_v1 = vpack.c.bf16 %v422_v58, %v420_v57  ;;  %v421_v2 = vld [vmem:[%s1419_s7 + $0x350] sm:$0xff]  ;;  %v360_v3 = vld [vmem:[%s1419_s7 + $0x168] sm:$0xff]  ;;  %v362_v4 = vld [vmem:[%s1419_s7 + $0x178] sm:$0xff]  ;;  %v826_v7 = vpack.c.bf16 %v357_v63, %v355_v62 }
  0x92   : > { %877 = vmatprep.subr.bf16.mxu0 %v876_v29  ;;  %v424_v5 = vld [vmem:[%s1419_s7 + $0x368] sm:$0xff]  ;;  %v426_v6 = vld [vmem:[%s1419_s7 + $0x378] sm:$0xff]  ;;  %v359_v8 = vld [vmem:[%s1419_s7 + $0x160] sm:$0xff]  ;;  %v890_v9 = vpack.c.bf16 %v421_v2, %v419_v0  ;;  %v828_v10 = vpack.c.bf16 %v362_v4, %v360_v3 }
  0x93   : > { %v361_v11 = vld [vmem:[%s1419_s7 + $0x170] sm:$0xff]  ;;  %v423_v12 = vld [vmem:[%s1419_s7 + $0x360] sm:$0xff]  ;;  %v892_v14 = vpack.c.bf16 %v426_v6, %v424_v5  ;;  %v364_v15 = vld [vmem:[%s1419_s7 + $0x188] sm:$0xff] }
  0x94   : > { %815 = vmatpush1.bf16.msra.mxu1 %v814_v35  ;;  %v425_v13 = vld [vmem:[%s1419_s7 + $0x370] sm:$0xff]  ;;  %v366_v16 = vld [vmem:[%s1419_s7 + $0x198] sm:$0xff]  ;;  %v312_v17 = vld [vmem:[%s1438_s26 + $0x8] sm:$0xff]  ;;  %v830_v21 = vpack.c.bf16 %v361_v11, %v359_v8 }
  0x95   : > { %879 = vmatpush1.bf16.msra.mxu0 %v878_v36  ;;  %817 = vmatprep.subr.bf16.mxu1 %v816_v37  ;;  %v428_v18 = vld [vmem:[%s1419_s7 + $0x388] sm:$0xff]  ;;  %v430_v19 = vld [vmem:[%s1419_s7 + $0x398] sm:$0xff]  ;;  %v894_v22 = vpack.c.bf16 %v425_v13, %v423_v12  ;;  %v832_v23 = vpack.c.bf16 %v366_v16, %v364_v15  ;;  %v363_v24 = vld [vmem:[%s1419_s7 + $0x180] sm:$0xff]  ;;  %v597_v15 = vlaneseq (!%p779_p3) }
  0x96   : > { %881 = vmatprep.subr.bf16.mxu0 %v880_v41  ;;  %507 = vmatprep.mubr.f32.mxu1 %v312_v17  ;;  %v314_v20 = vld [vmem:[%s1438_s26 + $0x18] sm:$0xff]  ;;  %v365_v25 = vld [vmem:[%s1419_s7 + $0x190] sm:$0xff]  ;;  %v427_v26 = vld [vmem:[%s1419_s7 + $0x380] sm:$0xff]  ;;  %v896_v27 = vpack.c.bf16 %v430_v19, %v428_v18 }
  0x97   : > { %578 = vmatprep.mubr.f32.mxu0 %v314_v20  ;;  %v429_v28 = vld [vmem:[%s1419_s7 + $0x390] sm:$0xff]  ;;  %v368_v29 = vld [vmem:[%s1419_s7 + $0x1a8] sm:$0xff]  ;;  %v370_v30 = vld [vmem:[%s1419_s7 + $0x1b8] sm:$0xff]  ;;  %v834_v33 = vpack.c.bf16 %v365_v25, %v363_v24  ;;  %v598_v16 = vshrl.u32 (!%p779_p3), %v597_v15, 7 }
  0x98   : > { %819 = vmatpush1.bf16.msra.mxu1 %v818_v47  ;;  %v432_v31 = vld [vmem:[%s1419_s7 + $0x3a8] sm:$0xff]  ;;  %v434_v32 = vld [vmem:[%s1419_s7 + $0x3b8] sm:$0xff]  ;;  %v898_v34 = vpack.c.bf16 %v429_v28, %v427_v26  ;;  %v836_v35 = vpack.c.bf16 %v370_v30, %v368_v29  ;;  %v367_v36 = vld [vmem:[%s1419_s7 + $0x1a0] sm:$0xff] }
  0x99   : > { %883 = vmatpush1.bf16.msra.mxu0 %v882_v48  ;;  %821 = vmatprep.subr.bf16.mxu1 %v820_v49  ;;  %v369_v37 = vld [vmem:[%s1419_s7 + $0x1b0] sm:$0xff]  ;;  %v431_v38 = vld [vmem:[%s1419_s7 + $0x3a0] sm:$0xff]  ;;  %v900_v39 = vpack.c.bf16 %v434_v32, %v432_v31  ;;  %v372_v41 = vld [vmem:[%s1419_s7 + $0x1c8] sm:$0xff]  ;;  %v599_v18 = vsub.s32 (!%p779_p3), 0, %v598_v16  ;;  %v603_v19 = vsub.s32 (!%p779_p3), 1, %v598_v16 }
  0x9a   : > { %885 = vmatprep.subr.bf16.mxu0 %v884_v53  ;;  %v433_v40 = vld [vmem:[%s1419_s7 + $0x3b0] sm:$0xff]  ;;  %v374_v42 = vld [vmem:[%s1419_s7 + $0x1d8] sm:$0xff]  ;;  %v436_v43 = vld [vmem:[%s1419_s7 + $0x3c8] sm:$0xff]  ;;  %v838_v45 = vpack.c.bf16 %v369_v37, %v367_v36 }
  0x9b   : > { %v438_v44 = vld [vmem:[%s1419_s7 + $0x3d8] sm:$0xff]  ;;  %v902_v46 = vpack.c.bf16 %v433_v40, %v431_v38  ;;  %v840_v47 = vpack.c.bf16 %v374_v42, %v372_v41  ;;  %v371_v48 = vld [vmem:[%s1419_s7 + $0x1c0] sm:$0xff]  ;;  %v373_v49 = vld [vmem:[%s1419_s7 + $0x1d0] sm:$0xff] }
  0x9c   : > { %823 = vmatpush1.bf16.msra.mxu1 %v822_v59  ;;  %v435_v50 = vld [vmem:[%s1419_s7 + $0x3c0] sm:$0xff]  ;;  %v904_v51 = vpack.c.bf16 %v438_v44, %v436_v43  ;;  %v437_v52 = vld [vmem:[%s1419_s7 + $0x3d0] sm:$0xff]  ;;  %v376_v53 = vld [vmem:[%s1419_s7 + $0x1e8] sm:$0xff]  ;;  %v842_v57 = vpack.c.bf16 %v373_v49, %v371_v48 }
  0x9d   : > { %887 = vmatpush1.bf16.msra.mxu0 %v886_v60  ;;  %825 = vmatprep.subr.bf16.mxu1 %v824_v61  ;;  %v378_v54 = vld [vmem:[%s1419_s7 + $0x1f8] sm:$0xff]  ;;  %v440_v55 = vld [vmem:[%s1419_s7 + $0x3e8] sm:$0xff]  ;;  %v906_v58 = vpack.c.bf16 %v437_v52, %v435_v50  ;;  %v375_v60 = vld [vmem:[%s1419_s7 + $0x1e0] sm:$0xff] }
  0x9e   : > { %889 = vmatprep.subr.bf16.mxu0 %v888_v1  ;;  %v442_v56 = vld [vmem:[%s1419_s7 + $0x3f8] sm:$0xff]  ;;  %v844_v59 = vpack.c.bf16 %v378_v54, %v376_v53  ;;  %v377_v61 = vld [vmem:[%s1419_s7 + $0x1f0] sm:$0xff]  ;;  %v439_v63 = vld [vmem:[%s1419_s7 + $0x3e0] sm:$0xff] }
  0x9f   : > { %v908_v62 = vpack.c.bf16 %v442_v56, %v440_v55  ;;  %v441_v0 = vld [vmem:[%s1419_s7 + $0x3f0] sm:$0xff]  ;;  %v846_v1 = vpack.c.bf16 %v377_v61, %v375_v60  ;;  %v311_v3 = vld [vmem:[%s1438_s26] sm:$0xff] }
  0xa0   : > { %827 = vmatpush1.bf16.msra.mxu1 %v826_v7  ;;  %v910_v2 = vpack.c.bf16 %v441_v0, %v439_v63  ;;  %v313_v4 = vld [vmem:[%s1438_s26 + $0x10] sm:$0xff]  ;;  %v309_v6 = vld [vmem:[%s1443_s4] sm:$0xff] }
  0xa1   : > { %891 = vmatpush1.bf16.msra.mxu0 %v890_v9  ;;  %829 = vmatprep.subr.bf16.mxu1 %v828_v10  ;;  %v310_v10 = vld [vmem:[%s1443_s4 + $0x8] sm:$0xff]  ;;  %v595_v17 = vld [vmem:[%s239_s10] sm:$0x3] (!%p779_p3) }
  0xa2   : > { %893 = vmatprep.subr.bf16.mxu0 %v892_v14 }
  0xa4   : > { %831 = vmatpush1.bf16.msra.mxu1 %v830_v21 }
  0xa5   : > { %895 = vmatpush1.bf16.msra.mxu0 %v894_v22  ;;  %833 = vmatprep.subr.bf16.mxu1 %v832_v23  ;;  %v600_v22 = vrot.slane (!%p779_p3), %v595_v17, %v599_v18  ;;  %v604_v23 = vrot.slane (!%p779_p3), %v595_v17, %v603_v19 }
  0xa6   : > { %897 = vmatprep.subr.bf16.mxu0 %v896_v27 }
  0xa8   : > { %835 = vmatpush1.bf16.msra.mxu1 %v834_v33 }
  0xa9   : > { %899 = vmatpush1.bf16.msra.mxu0 %v898_v34  ;;  %837 = vmatprep.subr.bf16.mxu1 %v836_v35 }
  0xaa   : > { %901 = vmatprep.subr.bf16.mxu0 %v900_v39 }
  0xac   : > { %839 = vmatpush1.bf16.msra.mxu1 %v838_v45 }
  0xad   : > { %903 = vmatpush1.bf16.msra.mxu0 %v902_v46  ;;  %841 = vmatprep.subr.bf16.mxu1 %v840_v47 }
  0xae   : > { %905 = vmatprep.subr.bf16.mxu0 %v904_v51 }
  0xb0   : > { %843 = vmatpush1.bf16.msra.mxu1 %v842_v57 }
  0xb1   : > { %907 = vmatpush1.bf16.msra.mxu0 %v906_v58  ;;  %845 = vmatprep.subr.bf16.mxu1 %v844_v59 }
  0xb2   : > { %909 = vmatprep.subr.bf16.mxu0 %v908_v62 }
  0xb4   : > { %847 = vmatpush1.bf16.msra.mxu1 %v846_v1 }
  0xb5   : > { %911 = vmatpush1.bf16.msra.mxu0 %v910_v2 }
  0xb7   : > { %508 = vmatmul.mubr.f32.vlgmr.msra.gmra.mrb[0].mxu1 %v311_v3 }
  0xb8   : > { %579 = vmatmul.mubr.f32.vlgmr.msra.gmra.mrb[0].mxu0 %v313_v4 }
 0x18a   : > { %v509_v5 = vpop.f32.mrb[0].mxu1 }
 0x18b   : > { %v580_v7 = vpop.f32.mrb[0].mxu0  ;;  %v511_v8 = vpop.f32.mrb[1].mxu1  ;;  %592 = sbr.rel (%p779_p3) target bundleno = 415 (0x19f), region = 48 }
 0x18c   : > { %v581_v9 = vadd.f32 %v580_v7, %v509_v5  ;;  %v582_v11 = vpop.f32.mrb[1].mxu0 }
 0x18d   : > { %v583_v12 = vadd.f32 %v582_v11, %v511_v8 }
 0x18e   : > { %v585_v13 = vadd.f32 %v581_v9, %v309_v6 }
 0x18f   : > { %v586_v14 = vadd.f32 %v583_v12, %v310_v10 }
 0x190   : > { %587 = vst [vmem:[%s1443_s4] sm:$0xff] %v585_v13 }
 0x191   : > { %588 = vst [vmem:[%s1443_s4 + $0x8] sm:$0xff] %v586_v14 }
 0x197   : > { %v593_v20 = vld [vmem:[%s1443_s4] sm:$0xff] }
 0x198   : > { %v594_v21 = vld [vmem:[%s1443_s4 + $0x8] sm:$0xff]  ;;  %v607_v24 = vadd.f32 %v600_v22, %v593_v20 }
 0x199   : > { %v608_v25 = vadd.f32 %v604_v23, %v594_v21 }
 0x19a   : > { %vm609_vm0 = vcmp.ge.f32.partialorder %v607_v24, 0.0  ;;  %v611_v26 = vmul.f32 0.1, %v607_v24 }
 0x19b   : > { %vm610_vm1 = vcmp.ge.f32.partialorder %v608_v25, 0.0  ;;  %v612_v27 = vmul.f32 0.1, %v608_v25 }
 0x19c   : > { %v613_v28 = vsel %vm609_vm0, %v607_v24, %v611_v26 }
 0x19d   : > { %v614_v29 = vsel %vm610_vm1, %v608_v25, %v612_v27  ;;  %615 = vst [vmem:[%s1443_s4] sm:$0xff] %v613_v28 }
 0x19e   : > { %616 = vst [vmem:[%s1443_s4 + $0x8] sm:$0xff] %v614_v29 }
 0x19f PF: > { %s19_s22 = sadd.s32 1, %s1172_s22   ;;  %s1649_s7 = sld [smem:[#allocation8_spill]] }
 0x1a0   : > { %p16_p11 = scmp.ge.s32.totalorder %s19_s22, 22   ;;  %s1650_s12 = smov %s1136_s13 }
 0x1a1   : > { %s1651_s13 = smov %s1140_s14  ;;  %s1652_s14 = smov %s1368_s29 }
 0x1a2   : > { %s1653_s15 = smov %s1148_s16  ;;  %s1654_s16 = smov %s1152_s17 }
 0x1a3   : > { %s1655_s17 = smov %s1373_s6  ;;  %s1656_s18 = smov %s1164_s20 }
 0x1a4   : > { %s1657_s19 = smov %s1168_s21  ;;  %s1658_s20 = smov %s1661_s23 }
 0x1a5   : > { %s1659_s21 = smov %s1649_s7  ;;  %18 = sbr.rel (!%p16_p11) target bundleno = 11 (0xb), region = 96 }
 0x1ac   :  { %647 = vsyncpa [#allocation3], 1 }
 0x1ad   :  { %649 = vsyncpa [#allocation3 + $0x1], 1 }
 0x1ae   :  { %650 = vsyncpa [#allocation5], 1 }
 0x1af   :  { %652 = vsyncpa [#allocation5 + $0x1], 1 }

// kernel: pd_forward.7
= control target key start
LH: loop header
LB: loop body
LE: loop exit
PB: predicated region body
PF: predicated region fallthrough
CT: control target
= control target key end

     0   :  { %8 = vsyncpa [#allocation3], 0  ;;  %s1388_s0 = inlined_call_operand.vmem [shape: f32[8,5120], index: 0, kind: input, shape index: {}]   ;;  %s1389_s1 = inlined_call_operand.hbm [shape: f32[5120,1024], index: 1, kind: input, shape index: {}]   ;;  %s1390_s2 = inlined_call_operand.vmem [shape: f32[1,1024], index: 2, kind: input, shape index: {}]   ;;  %s1391_s3 = inlined_call_operand.vmem [shape: f32[8,1024], index: 3, kind: output, shape index: {}]  }
   0x1   :  { %10 = vsyncpa [#allocation3 + $0x1], 0  ;;  %s1074_s12 = smov 0   ;;  %s1076_s13 = smov 0  }
   0x2   :  { %s1078_s14 = smov 0   ;;  %s1080_s15 = smov 0  }
   0x3   :  { %s1082_s16 = smov 0   ;;  %s1084_s17 = smov 0  }
   0x4   :  { %s1086_s18 = smov 0   ;;  %s1088_s19 = smov 0  }
   0x5 LB: > { %s725_s20 = sadd.s32 4294967295, %s1047_s19   ;;  %s28_s21 = sadd.s32 1, %s1039_s17  ;;  %s1047_s19 = sphi %s1088_s19, %s16_s19   ;;  %s1043_s18 = sphi %s1086_s18, %s1401_s18   ;;  %s1039_s17 = sphi %s1084_s17, %s1400_s17   ;;  %s1035_s16 = sphi %s1082_s16, %s1399_s16   ;;  %s1031_s15 = sphi %s1080_s15, %s1398_s15   ;;  %s1027_s14 = sphi %s1078_s14, %s1397_s14   ;;  %s1023_s13 = sphi %s1076_s13, %s1396_s13   ;;  %s1019_s12 = sphi %s1074_s12, %s1395_s12  }
   0x6   : > { %p29_p0 = scmp.ge.s32.totalorder %s28_s21, 10  ;;  %s31_s22 = sadd.s32 1, %s1043_s18 }
   0x7   : > { %s72_s23 = sadd.s32 1, %s1027_s14  ;;  %p79_p1 = scmp.ne.s32.totalorder %s1027_s14, %s1023_s13 }
   0x8   : > { %s1403_s21 = smov (%p29_p0, %s28_s21), 0  ;;  %s1405_s22 = smov (!%p29_p0, %s31_s22), %s1043_s18 }
   0x9   : > { %s67_s24 = ssub.s32 %s1039_s17, %s1403_s21  ;;  %p80_p2 = scmp.eq.s32.totalorder %s1047_s19, 0 }
   0xa   : > { %p33_p3 = scmp.ge.s32.totalorder %s1405_s22, 4  ;;  %p85_p4 = scmp.ne.s32.totalorder %s1023_s13, %s1019_s12 }
   0xb   : > { %p1125_p5 = por %p80_p2, %p79_p1  ;;  %p86_p6 = scmp.eq.s32.totalorder %s725_s20, 0 }
   0xc   : > { %s1407_s22 = smov (%p33_p3, %s1405_s22), 0  ;;  %p882_p8 = scmp.lt.s32.totalorder %s1047_s19, 40 }
   0xd   : > { %p1131_p7 = por %p86_p6, %p85_p4  ;;  %s68_s27 = ssub.s32 %s1043_s18, %s1407_s22 }
   0xe   : > { %s69_s28 = sor.u32 %s68_s27, %s67_s24  ;;  %s176_s29 = sand.u32 1, %s1027_s14  }
   0xf   : > { %p70_p9 = scmp.eq.s32.totalorder %s69_s28, 0  ;;  %s729_s30 = sshll.u32 %s176_s29, 10 }
  0x10   : > { %s731_s4 = sshll.u32 %s1043_s18, 1  ;;  %s745_s6 = sshll.u32 %s1039_s17, 9 }
  0x11   : > { %s1141_s5 = scalar_select %p70_p9, %s1027_s14, %s72_s23  }
  0x12   : > { %s187_s7 = sadd.s32 %s745_s6, %s731_s4  ;;  %s180_s8 = scalar_lea.vmem [#allocation2], %s729_s30 }
  0x13   : > { %s190_s9 = sshll.u32 %s180_s8, 4  ;;  %s733_s10 = sshll.u32 %s187_s7, 7  ;;  %s1144_s9 = int_to_ptr.vmem [resolvable:$true] %s190_s9 }
  0x14   : > { %s1149_s20 = scalar_lea.hbm %s1389_s1, %s733_s10  ;;  %p1155_p10 = pnand %p882_p8, %p1125_p5 }
  0x15   : > { %s1159_s24 = scalar_lea.sflag [#allocation3], %s176_s29  ;;  %s951_s27 = scalar_lea.hbm %s1149_s20, 16384 }
  0x16   : > { %p952_p11 = scmp.ne.s32.totalorder %s1149_s20, %s951_s27  ;;  %p953_p12 = pneg %p1155_p10 }
  0x17   : > { %s956_s30 = scalar_lea.hbm %s1389_s1, 655360  ;;  %p957_p1 = scmp.lt.u32.totalorder %s1149_s20, %s1389_s1 }
  0x18   : > { %p954_p13 = pnand %p953_p12, %p952_p11  ;;  %p958_p2 = scmp.lt.u32.totalorder %s956_s30, %s951_s27 }
  0x19   : > { %p960_p4 = scmp.lt.u32.totalorder %s951_s27, %s1149_s20 }
  0x1a   : > { %p955_p0 = pneg %p954_p13  ;;  %p959_p3 = por %p958_p2, %p957_p1 }
  0x1c   : > { %p961_p5 = por %p960_p4, %p959_p3 }
  0x1e   : > { %p962_p6 = pnand %p961_p5, %p955_p0 }
  0x20   : > { %965 = shalt.err (!%p962_p6)
}
  0x21   : > { %s966_s29 = scalar_lea.vmem %s1144_s9, 16384  ;;  %s1049_s7 = smov [#allocation2]  }
  0x22   : > { %p967_p8 = scmp.ne.s32.totalorder %s1144_s9, %s966_s29  ;;  %s971_s8 = sshll.u32 %s1049_s7, 4  ;;  %s972_s8 = int_to_ptr.vmem [resolvable:$false] %s971_s8 }
  0x23   : > { %s973_s10 = scalar_lea.vmem %s972_s8, 32768  ;;  %p974_p13 = scmp.lt.s32.totalorder %s1144_s9, %s972_s8 }
  0x24   : > { %p969_p9 = pnand %p967_p8, %p953_p12  ;;  %p975_p1 = scmp.lt.s32.totalorder %s973_s10, %s966_s29 }
  0x26   : > { %p970_p11 = pneg %p969_p9  ;;  %p976_p2 = por %p975_p1, %p974_p13 }
  0x28   : > { %p977_p3 = pnand %p976_p2, %p970_p11 }
  0x2a   : > { %980 = shalt.err (!%p977_p3)
}
  0x2b   : > { %s1050_s11 = smov 1024   ;;  %s1051_s12 = smov 256  }
  0x2c   : > { %s1052_s27 = smov 16   ;;  %p734_p12 = scmp.ge.s32.totalorder %s1047_s19, 1 }
  0x2d   : > { %881 = dma.hbm_to_vmem [thread:$0]  (!%p1155_p10), %s1149_s20, 16384, %s1144_s9, %s1159_s24, %s1050_s11, %s1051_s12, %s1052_s27  }
  0x2e   : > { %p206_p0 = scmp.lt.s32.totalorder %s1047_s19, 41 }
  0x30   : > { %p207_p4 = pnand %p734_p12, %p206_p0 }
  0x31   : > { %s212_s25 = sand.u32 (!%p207_p4), 1, %s1023_s13  }
  0x32   : > { %210 = sbr.rel (%p207_p4) target bundleno = 370 (0x172), region = 32  ;;  %s735_s28 = sshll.u32 (!%p207_p4), %s212_s25, 10 }
  0x33   : > { %s213_s30 = scalar_lea.sflag (!%p207_p4), [#allocation3], %s212_s25  ;;  %s1190_s4 = scalar_lea.vmem (!%p207_p4), [#allocation2], %s735_s28 }
  0x39   : > { %1014 = dma.done.wait (%p1131_p7), %s213_s30, 16384  }
  0x3a   : > { %1016 = vsyncadd (%p1131_p7), %s213_s30, 4294950912  ;;  %s736_s23 = sshll.u32 %s1031_s15, 2  ;;  %s738_s9 = sshll.u32 %s1035_s16, 1 }
  0x3b   : > { %p259_p10 = scmp.lt.s32.totalorder %s736_s23, 39  ;;  %p269_p5 = scmp.lt.s32.totalorder %s738_s9, 7 }
  0x3c   : > { %p741_p7 = scmp.ne.s32.totalorder %s1031_s15, 0 }
  0x3d   : > { %s1409_s23 = smov (!%p259_p10, %s736_s23), 39  ;;  %s1411_s9 = smov (!%p269_p5, %s738_s9), 7 }
  0x3e   : > { %s737_s20 = sshll.u32 %s1409_s23, 3  ;;  %s271_s8 = scalar_lea.vmem %s1390_s2, %s1411_s9  ;;  %v1053_v0 = vmov (!%p741_p7), 0.0  }
  0x3f   : > { %s1203_s29 = scalar_lea.vmem %s1388_s0, %s737_s20  ;;  %s740_s10 = sshll.u32 %s1411_s9, 3 }
  0x40   : > { %s1213_s12 = scalar_lea.vmem %s1391_s3, %s740_s10  ;;  %286 = sbr.rel (%p741_p7) target bundleno = 71 (0x47), region = 40 }
  0x41   : > { %287 = vst [vmem:[%s1213_s12] sm:$0xff] (!%p741_p7), %v1053_v0  ;;  %288 = vst [vmem:[%s1213_s12 + $0x8] sm:$0xff] (!%p741_p7), %v1053_v0 }
  0x47 PF: > { %v296_v1 = vld [vmem:[%s1190_s4 + $0x8] sm:$0xff]  ;;  %v298_v2 = vld [vmem:[%s1190_s4 + $0x18] sm:$0xff]  ;;  %v295_v6 = vld [vmem:[%s1190_s4] sm:$0xff]  ;;  %p742_p6 = scmp.ne.s32.totalorder %s1031_s15, 9 }
  0x48   : > { %v360_v3 = vld [vmem:[%s1190_s4 + $0x208] sm:$0xff]  ;;  %v746_v4 = vpack.c.bf16 %v298_v2, %v296_v1  ;;  %v362_v5 = vld [vmem:[%s1190_s4 + $0x218] sm:$0xff]  ;;  %v297_v7 = vld [vmem:[%s1190_s4 + $0x10] sm:$0xff] }
  0x49   : > { %v810_v8 = vpack.c.bf16 %v362_v5, %v360_v3  ;;  %v748_v9 = vpack.c.bf16 %v297_v7, %v295_v6  ;;  %v359_v10 = vld [vmem:[%s1190_s4 + $0x200] sm:$0xff]  ;;  %v361_v11 = vld [vmem:[%s1190_s4 + $0x210] sm:$0xff]  ;;  %v300_v12 = vld [vmem:[%s1190_s4 + $0x28] sm:$0xff] }
  0x4a   : > { %747 = vmatprep.subr.bf16.mxu1 %v746_v4  ;;  %v812_v13 = vpack.c.bf16 %v361_v11, %v359_v10  ;;  %v302_v14 = vld [vmem:[%s1190_s4 + $0x38] sm:$0xff]  ;;  %v364_v15 = vld [vmem:[%s1190_s4 + $0x228] sm:$0xff]  ;;  %v299_v19 = vld [vmem:[%s1190_s4 + $0x20] sm:$0xff] }
  0x4b   : > { %v366_v16 = vld [vmem:[%s1190_s4 + $0x238] sm:$0xff]  ;;  %811 = vmatprep.subr.bf16.mxu0 %v810_v8  ;;  %749 = vmatpush1.bf16.msra.mxu1 %v748_v9  ;;  %v750_v17 = vpack.c.bf16 %v302_v14, %v300_v12  ;;  %v301_v20 = vld [vmem:[%s1190_s4 + $0x30] sm:$0xff]  ;;  %v363_v21 = vld [vmem:[%s1190_s4 + $0x220] sm:$0xff] }
  0x4c   : > { %v814_v18 = vpack.c.bf16 %v366_v16, %v364_v15  ;;  %813 = vmatpush1.bf16.msra.mxu0 %v812_v13  ;;  %v752_v22 = vpack.c.bf16 %v301_v20, %v299_v19  ;;  %v365_v23 = vld [vmem:[%s1190_s4 + $0x230] sm:$0xff]  ;;  %v304_v24 = vld [vmem:[%s1190_s4 + $0x48] sm:$0xff]  ;;  %v306_v25 = vld [vmem:[%s1190_s4 + $0x58] sm:$0xff] }
  0x4d   : > { %751 = vmatprep.subr.bf16.mxu1 %v750_v17  ;;  %v816_v26 = vpack.c.bf16 %v365_v23, %v363_v21  ;;  %v754_v27 = vpack.c.bf16 %v306_v25, %v304_v24  ;;  %v368_v28 = vld [vmem:[%s1190_s4 + $0x248] sm:$0xff]  ;;  %v370_v29 = vld [vmem:[%s1190_s4 + $0x258] sm:$0xff]  ;;  %v303_v30 = vld [vmem:[%s1190_s4 + $0x40] sm:$0xff] }
  0x4e   : > { %815 = vmatprep.subr.bf16.mxu0 %v814_v18  ;;  %v818_v31 = vpack.c.bf16 %v370_v29, %v368_v28  ;;  %v305_v32 = vld [vmem:[%s1190_s4 + $0x50] sm:$0xff]  ;;  %v367_v33 = vld [vmem:[%s1190_s4 + $0x240] sm:$0xff]  ;;  %v308_v36 = vld [vmem:[%s1190_s4 + $0x68] sm:$0xff] }
  0x4f   : > { %v369_v34 = vld [vmem:[%s1190_s4 + $0x250] sm:$0xff]  ;;  %753 = vmatpush1.bf16.msra.mxu1 %v752_v22  ;;  %v756_v35 = vpack.c.bf16 %v305_v32, %v303_v30  ;;  %v310_v37 = vld [vmem:[%s1190_s4 + $0x78] sm:$0xff]  ;;  %v372_v38 = vld [vmem:[%s1190_s4 + $0x268] sm:$0xff] }
  0x50   : > { %817 = vmatpush1.bf16.msra.mxu0 %v816_v26  ;;  %755 = vmatprep.subr.bf16.mxu1 %v754_v27  ;;  %v820_v39 = vpack.c.bf16 %v369_v34, %v367_v33  ;;  %v758_v40 = vpack.c.bf16 %v310_v37, %v308_v36  ;;  %v374_v41 = vld [vmem:[%s1190_s4 + $0x278] sm:$0xff]  ;;  %v307_v42 = vld [vmem:[%s1190_s4 + $0x60] sm:$0xff]  ;;  %v309_v43 = vld [vmem:[%s1190_s4 + $0x70] sm:$0xff] }
  0x51   : > { %819 = vmatprep.subr.bf16.mxu0 %v818_v31  ;;  %v822_v44 = vpack.c.bf16 %v374_v41, %v372_v38  ;;  %v371_v45 = vld [vmem:[%s1190_s4 + $0x260] sm:$0xff]  ;;  %v373_v46 = vld [vmem:[%s1190_s4 + $0x270] sm:$0xff]  ;;  %v312_v47 = vld [vmem:[%s1190_s4 + $0x88] sm:$0xff]  ;;  %v760_v51 = vpack.c.bf16 %v309_v43, %v307_v42 }
  0x52   : > { %v314_v48 = vld [vmem:[%s1190_s4 + $0x98] sm:$0xff]  ;;  %v376_v49 = vld [vmem:[%s1190_s4 + $0x288] sm:$0xff]  ;;  %v824_v52 = vpack.c.bf16 %v373_v46, %v371_v45  ;;  %v311_v54 = vld [vmem:[%s1190_s4 + $0x80] sm:$0xff] }
  0x53   : > { %v378_v50 = vld [vmem:[%s1190_s4 + $0x298] sm:$0xff]  ;;  %757 = vmatpush1.bf16.msra.mxu1 %v756_v35  ;;  %v762_v53 = vpack.c.bf16 %v314_v48, %v312_v47  ;;  %v313_v55 = vld [vmem:[%s1190_s4 + $0x90] sm:$0xff]  ;;  %v375_v56 = vld [vmem:[%s1190_s4 + $0x280] sm:$0xff] }
  0x54   : > { %821 = vmatpush1.bf16.msra.mxu0 %v820_v39  ;;  %759 = vmatprep.subr.bf16.mxu1 %v758_v40  ;;  %v826_v57 = vpack.c.bf16 %v378_v50, %v376_v49  ;;  %v377_v58 = vld [vmem:[%s1190_s4 + $0x290] sm:$0xff]  ;;  %v316_v59 = vld [vmem:[%s1190_s4 + $0xa8] sm:$0xff]  ;;  %v318_v60 = vld [vmem:[%s1190_s4 + $0xb8] sm:$0xff]  ;;  %v764_v63 = vpack.c.bf16 %v313_v55, %v311_v54 }
  0x55   : > { %823 = vmatprep.subr.bf16.mxu0 %v822_v44  ;;  %v380_v61 = vld [vmem:[%s1190_s4 + $0x2a8] sm:$0xff]  ;;  %v382_v62 = vld [vmem:[%s1190_s4 + $0x2b8] sm:$0xff]  ;;  %v828_v0 = vpack.c.bf16 %v377_v58, %v375_v56  ;;  %v766_v1 = vpack.c.bf16 %v318_v60, %v316_v59  ;;  %v315_v2 = vld [vmem:[%s1190_s4 + $0xa0] sm:$0xff] }
  0x56   : > { %v317_v3 = vld [vmem:[%s1190_s4 + $0xb0] sm:$0xff]  ;;  %v379_v4 = vld [vmem:[%s1190_s4 + $0x2a0] sm:$0xff]  ;;  %v830_v5 = vpack.c.bf16 %v382_v62, %v380_v61  ;;  %v320_v7 = vld [vmem:[%s1190_s4 + $0xc8] sm:$0xff] }
  0x57   : > { %761 = vmatpush1.bf16.msra.mxu1 %v760_v51  ;;  %v381_v6 = vld [vmem:[%s1190_s4 + $0x2b0] sm:$0xff]  ;;  %v322_v8 = vld [vmem:[%s1190_s4 + $0xd8] sm:$0xff]  ;;  %v384_v9 = vld [vmem:[%s1190_s4 + $0x2c8] sm:$0xff]  ;;  %v768_v11 = vpack.c.bf16 %v317_v3, %v315_v2 }
  0x58   : > { %825 = vmatpush1.bf16.msra.mxu0 %v824_v52  ;;  %763 = vmatprep.subr.bf16.mxu1 %v762_v53  ;;  %v386_v10 = vld [vmem:[%s1190_s4 + $0x2d8] sm:$0xff]  ;;  %v832_v12 = vpack.c.bf16 %v381_v6, %v379_v4  ;;  %v770_v13 = vpack.c.bf16 %v322_v8, %v320_v7  ;;  %v319_v14 = vld [vmem:[%s1190_s4 + $0xc0] sm:$0xff]  ;;  %v321_v15 = vld [vmem:[%s1190_s4 + $0xd0] sm:$0xff] }
  0x59   : > { %827 = vmatprep.subr.bf16.mxu0 %v826_v57  ;;  %v383_v16 = vld [vmem:[%s1190_s4 + $0x2c0] sm:$0xff]  ;;  %v834_v17 = vpack.c.bf16 %v386_v10, %v384_v9  ;;  %v385_v18 = vld [vmem:[%s1190_s4 + $0x2d0] sm:$0xff]  ;;  %v324_v19 = vld [vmem:[%s1190_s4 + $0xe8] sm:$0xff]  ;;  %v772_v23 = vpack.c.bf16 %v321_v15, %v319_v14 }
  0x5a   : > { %v326_v20 = vld [vmem:[%s1190_s4 + $0xf8] sm:$0xff]  ;;  %v388_v21 = vld [vmem:[%s1190_s4 + $0x2e8] sm:$0xff]  ;;  %v836_v24 = vpack.c.bf16 %v385_v18, %v383_v16  ;;  %v323_v26 = vld [vmem:[%s1190_s4 + $0xe0] sm:$0xff] }
  0x5b   : > { %765 = vmatpush1.bf16.msra.mxu1 %v764_v63  ;;  %v390_v22 = vld [vmem:[%s1190_s4 + $0x2f8] sm:$0xff]  ;;  %v774_v25 = vpack.c.bf16 %v326_v20, %v324_v19  ;;  %v325_v27 = vld [vmem:[%s1190_s4 + $0xf0] sm:$0xff]  ;;  %v387_v28 = vld [vmem:[%s1190_s4 + $0x2e0] sm:$0xff] }
  0x5c   : > { %829 = vmatpush1.bf16.msra.mxu0 %v828_v0  ;;  %767 = vmatprep.subr.bf16.mxu1 %v766_v1  ;;  %v838_v29 = vpack.c.bf16 %v390_v22, %v388_v21  ;;  %v389_v30 = vld [vmem:[%s1190_s4 + $0x2f0] sm:$0xff]  ;;  %v328_v31 = vld [vmem:[%s1190_s4 + $0x108] sm:$0xff]  ;;  %v330_v32 = vld [vmem:[%s1190_s4 + $0x118] sm:$0xff]  ;;  %v776_v35 = vpack.c.bf16 %v325_v27, %v323_v26 }
  0x5d   : > { %831 = vmatprep.subr.bf16.mxu0 %v830_v5  ;;  %v392_v33 = vld [vmem:[%s1190_s4 + $0x308] sm:$0xff]  ;;  %v394_v34 = vld [vmem:[%s1190_s4 + $0x318] sm:$0xff]  ;;  %v840_v36 = vpack.c.bf16 %v389_v30, %v387_v28  ;;  %v778_v37 = vpack.c.bf16 %v330_v32, %v328_v31  ;;  %v327_v38 = vld [vmem:[%s1190_s4 + $0x100] sm:$0xff] }
  0x5e   : > { %v329_v39 = vld [vmem:[%s1190_s4 + $0x110] sm:$0xff]  ;;  %v391_v40 = vld [vmem:[%s1190_s4 + $0x300] sm:$0xff]  ;;  %v842_v41 = vpack.c.bf16 %v394_v34, %v392_v33  ;;  %v332_v43 = vld [vmem:[%s1190_s4 + $0x128] sm:$0xff] }
  0x5f   : > { %769 = vmatpush1.bf16.msra.mxu1 %v768_v11  ;;  %v393_v42 = vld [vmem:[%s1190_s4 + $0x310] sm:$0xff]  ;;  %v334_v44 = vld [vmem:[%s1190_s4 + $0x138] sm:$0xff]  ;;  %v396_v45 = vld [vmem:[%s1190_s4 + $0x328] sm:$0xff]  ;;  %v780_v47 = vpack.c.bf16 %v329_v39, %v327_v38 }
  0x60   : > { %833 = vmatpush1.bf16.msra.mxu0 %v832_v12  ;;  %771 = vmatprep.subr.bf16.mxu1 %v770_v13  ;;  %v398_v46 = vld [vmem:[%s1190_s4 + $0x338] sm:$0xff]  ;;  %v844_v48 = vpack.c.bf16 %v393_v42, %v391_v40  ;;  %v782_v49 = vpack.c.bf16 %v334_v44, %v332_v43  ;;  %v331_v50 = vld [vmem:[%s1190_s4 + $0x120] sm:$0xff]  ;;  %v333_v51 = vld [vmem:[%s1190_s4 + $0x130] sm:$0xff] }
  0x61   : > { %835 = vmatprep.subr.bf16.mxu0 %v834_v17  ;;  %v395_v52 = vld [vmem:[%s1190_s4 + $0x320] sm:$0xff]  ;;  %v846_v53 = vpack.c.bf16 %v398_v46, %v396_v45  ;;  %v397_v54 = vld [vmem:[%s1190_s4 + $0x330] sm:$0xff]  ;;  %v336_v55 = vld [vmem:[%s1190_s4 + $0x148] sm:$0xff]  ;;  %v784_v59 = vpack.c.bf16 %v333_v51, %v331_v50 }
  0x62   : > { %v338_v56 = vld [vmem:[%s1190_s4 + $0x158] sm:$0xff]  ;;  %v400_v57 = vld [vmem:[%s1190_s4 + $0x348] sm:$0xff]  ;;  %v848_v60 = vpack.c.bf16 %v397_v54, %v395_v52  ;;  %v335_v62 = vld [vmem:[%s1190_s4 + $0x140] sm:$0xff] }
  0x63   : > { %773 = vmatpush1.bf16.msra.mxu1 %v772_v23  ;;  %v402_v58 = vld [vmem:[%s1190_s4 + $0x358] sm:$0xff]  ;;  %v786_v61 = vpack.c.bf16 %v338_v56, %v336_v55  ;;  %v337_v63 = vld [vmem:[%s1190_s4 + $0x150] sm:$0xff]  ;;  %v399_v0 = vld [vmem:[%s1190_s4 + $0x340] sm:$0xff] }
  0x64   : > { %837 = vmatpush1.bf16.msra.mxu0 %v836_v24  ;;  %775 = vmatprep.subr.bf16.mxu1 %v774_v25  ;;  %v850_v1 = vpack.c.bf16 %v402_v58, %v400_v57  ;;  %v401_v2 = vld [vmem:[%s1190_s4 + $0x350] sm:$0xff]  ;;  %v340_v3 = vld [vmem:[%s1190_s4 + $0x168] sm:$0xff]  ;;  %v342_v4 = vld [vmem:[%s1190_s4 + $0x178] sm:$0xff]  ;;  %v788_v7 = vpack.c.bf16 %v337_v63, %v335_v62 }
  0x65   : > { %839 = vmatprep.subr.bf16.mxu0 %v838_v29  ;;  %v404_v5 = vld [vmem:[%s1190_s4 + $0x368] sm:$0xff]  ;;  %v406_v6 = vld [vmem:[%s1190_s4 + $0x378] sm:$0xff]  ;;  %v339_v8 = vld [vmem:[%s1190_s4 + $0x160] sm:$0xff]  ;;  %v852_v9 = vpack.c.bf16 %v401_v2, %v399_v0  ;;  %v790_v10 = vpack.c.bf16 %v342_v4, %v340_v3 }
  0x66   : > { %v341_v11 = vld [vmem:[%s1190_s4 + $0x170] sm:$0xff]  ;;  %v403_v12 = vld [vmem:[%s1190_s4 + $0x360] sm:$0xff]  ;;  %v854_v14 = vpack.c.bf16 %v406_v6, %v404_v5  ;;  %v344_v15 = vld [vmem:[%s1190_s4 + $0x188] sm:$0xff] }
  0x67   : > { %777 = vmatpush1.bf16.msra.mxu1 %v776_v35  ;;  %v405_v13 = vld [vmem:[%s1190_s4 + $0x370] sm:$0xff]  ;;  %v346_v16 = vld [vmem:[%s1190_s4 + $0x198] sm:$0xff]  ;;  %v292_v17 = vld [vmem:[%s1203_s29 + $0x8] sm:$0xff]  ;;  %v792_v21 = vpack.c.bf16 %v341_v11, %v339_v8 }
  0x68   : > { %841 = vmatpush1.bf16.msra.mxu0 %v840_v36  ;;  %779 = vmatprep.subr.bf16.mxu1 %v778_v37  ;;  %v408_v18 = vld [vmem:[%s1190_s4 + $0x388] sm:$0xff]  ;;  %v410_v19 = vld [vmem:[%s1190_s4 + $0x398] sm:$0xff]  ;;  %v856_v22 = vpack.c.bf16 %v405_v13, %v403_v12  ;;  %v794_v23 = vpack.c.bf16 %v346_v16, %v344_v15  ;;  %v343_v24 = vld [vmem:[%s1190_s4 + $0x180] sm:$0xff]  ;;  %v577_v15 = vlaneseq (!%p742_p6) }
  0x69   : > { %843 = vmatprep.subr.bf16.mxu0 %v842_v41  ;;  %487 = vmatprep.mubr.f32.mxu1 %v292_v17  ;;  %v294_v20 = vld [vmem:[%s1203_s29 + $0x18] sm:$0xff]  ;;  %v345_v25 = vld [vmem:[%s1190_s4 + $0x190] sm:$0xff]  ;;  %v407_v26 = vld [vmem:[%s1190_s4 + $0x380] sm:$0xff]  ;;  %v858_v27 = vpack.c.bf16 %v410_v19, %v408_v18 }
  0x6a   : > { %558 = vmatprep.mubr.f32.mxu0 %v294_v20  ;;  %v409_v28 = vld [vmem:[%s1190_s4 + $0x390] sm:$0xff]  ;;  %v348_v29 = vld [vmem:[%s1190_s4 + $0x1a8] sm:$0xff]  ;;  %v350_v30 = vld [vmem:[%s1190_s4 + $0x1b8] sm:$0xff]  ;;  %v796_v33 = vpack.c.bf16 %v345_v25, %v343_v24  ;;  %v578_v16 = vshrl.u32 (!%p742_p6), %v577_v15, 7 }
  0x6b   : > { %781 = vmatpush1.bf16.msra.mxu1 %v780_v47  ;;  %v412_v31 = vld [vmem:[%s1190_s4 + $0x3a8] sm:$0xff]  ;;  %v414_v32 = vld [vmem:[%s1190_s4 + $0x3b8] sm:$0xff]  ;;  %v860_v34 = vpack.c.bf16 %v409_v28, %v407_v26  ;;  %v798_v35 = vpack.c.bf16 %v350_v30, %v348_v29  ;;  %v347_v36 = vld [vmem:[%s1190_s4 + $0x1a0] sm:$0xff] }
  0x6c   : > { %845 = vmatpush1.bf16.msra.mxu0 %v844_v48  ;;  %783 = vmatprep.subr.bf16.mxu1 %v782_v49  ;;  %v349_v37 = vld [vmem:[%s1190_s4 + $0x1b0] sm:$0xff]  ;;  %v411_v38 = vld [vmem:[%s1190_s4 + $0x3a0] sm:$0xff]  ;;  %v862_v39 = vpack.c.bf16 %v414_v32, %v412_v31  ;;  %v352_v41 = vld [vmem:[%s1190_s4 + $0x1c8] sm:$0xff]  ;;  %v579_v18 = vsub.s32 (!%p742_p6), 0, %v578_v16  ;;  %v583_v19 = vsub.s32 (!%p742_p6), 1, %v578_v16 }
  0x6d   : > { %847 = vmatprep.subr.bf16.mxu0 %v846_v53  ;;  %v413_v40 = vld [vmem:[%s1190_s4 + $0x3b0] sm:$0xff]  ;;  %v354_v42 = vld [vmem:[%s1190_s4 + $0x1d8] sm:$0xff]  ;;  %v416_v43 = vld [vmem:[%s1190_s4 + $0x3c8] sm:$0xff]  ;;  %v800_v45 = vpack.c.bf16 %v349_v37, %v347_v36 }
  0x6e   : > { %v418_v44 = vld [vmem:[%s1190_s4 + $0x3d8] sm:$0xff]  ;;  %v864_v46 = vpack.c.bf16 %v413_v40, %v411_v38  ;;  %v802_v47 = vpack.c.bf16 %v354_v42, %v352_v41  ;;  %v351_v48 = vld [vmem:[%s1190_s4 + $0x1c0] sm:$0xff]  ;;  %v353_v49 = vld [vmem:[%s1190_s4 + $0x1d0] sm:$0xff] }
  0x6f   : > { %785 = vmatpush1.bf16.msra.mxu1 %v784_v59  ;;  %v415_v50 = vld [vmem:[%s1190_s4 + $0x3c0] sm:$0xff]  ;;  %v866_v51 = vpack.c.bf16 %v418_v44, %v416_v43  ;;  %v417_v52 = vld [vmem:[%s1190_s4 + $0x3d0] sm:$0xff]  ;;  %v356_v53 = vld [vmem:[%s1190_s4 + $0x1e8] sm:$0xff]  ;;  %v804_v57 = vpack.c.bf16 %v353_v49, %v351_v48 }
  0x70   : > { %849 = vmatpush1.bf16.msra.mxu0 %v848_v60  ;;  %787 = vmatprep.subr.bf16.mxu1 %v786_v61  ;;  %v358_v54 = vld [vmem:[%s1190_s4 + $0x1f8] sm:$0xff]  ;;  %v420_v55 = vld [vmem:[%s1190_s4 + $0x3e8] sm:$0xff]  ;;  %v868_v58 = vpack.c.bf16 %v417_v52, %v415_v50  ;;  %v355_v60 = vld [vmem:[%s1190_s4 + $0x1e0] sm:$0xff] }
  0x71   : > { %851 = vmatprep.subr.bf16.mxu0 %v850_v1  ;;  %v422_v56 = vld [vmem:[%s1190_s4 + $0x3f8] sm:$0xff]  ;;  %v806_v59 = vpack.c.bf16 %v358_v54, %v356_v53  ;;  %v357_v61 = vld [vmem:[%s1190_s4 + $0x1f0] sm:$0xff]  ;;  %v419_v63 = vld [vmem:[%s1190_s4 + $0x3e0] sm:$0xff] }
  0x72   : > { %v870_v62 = vpack.c.bf16 %v422_v56, %v420_v55  ;;  %v421_v0 = vld [vmem:[%s1190_s4 + $0x3f0] sm:$0xff]  ;;  %v808_v1 = vpack.c.bf16 %v357_v61, %v355_v60  ;;  %v291_v3 = vld [vmem:[%s1203_s29] sm:$0xff] }
  0x73   : > { %789 = vmatpush1.bf16.msra.mxu1 %v788_v7  ;;  %v872_v2 = vpack.c.bf16 %v421_v0, %v419_v63  ;;  %v293_v4 = vld [vmem:[%s1203_s29 + $0x10] sm:$0xff]  ;;  %v289_v6 = vld [vmem:[%s1213_s12] sm:$0xff] }
  0x74   : > { %853 = vmatpush1.bf16.msra.mxu0 %v852_v9  ;;  %791 = vmatprep.subr.bf16.mxu1 %v790_v10  ;;  %v290_v10 = vld [vmem:[%s1213_s12 + $0x8] sm:$0xff]  ;;  %v575_v17 = vld [vmem:[%s271_s8] sm:$0x3] (!%p742_p6) }
  0x75   : > { %855 = vmatprep.subr.bf16.mxu0 %v854_v14 }
  0x77   : > { %793 = vmatpush1.bf16.msra.mxu1 %v792_v21 }
  0x78   : > { %857 = vmatpush1.bf16.msra.mxu0 %v856_v22  ;;  %795 = vmatprep.subr.bf16.mxu1 %v794_v23  ;;  %v580_v22 = vrot.slane (!%p742_p6), %v575_v17, %v579_v18  ;;  %v584_v23 = vrot.slane (!%p742_p6), %v575_v17, %v583_v19 }
  0x79   : > { %859 = vmatprep.subr.bf16.mxu0 %v858_v27 }
  0x7b   : > { %797 = vmatpush1.bf16.msra.mxu1 %v796_v33 }
  0x7c   : > { %861 = vmatpush1.bf16.msra.mxu0 %v860_v34  ;;  %799 = vmatprep.subr.bf16.mxu1 %v798_v35 }
  0x7d   : > { %863 = vmatprep.subr.bf16.mxu0 %v862_v39 }
  0x7f   : > { %801 = vmatpush1.bf16.msra.mxu1 %v800_v45 }
  0x80   : > { %865 = vmatpush1.bf16.msra.mxu0 %v864_v46  ;;  %803 = vmatprep.subr.bf16.mxu1 %v802_v47 }
  0x81   : > { %867 = vmatprep.subr.bf16.mxu0 %v866_v51 }
  0x83   : > { %805 = vmatpush1.bf16.msra.mxu1 %v804_v57 }
  0x84   : > { %869 = vmatpush1.bf16.msra.mxu0 %v868_v58  ;;  %807 = vmatprep.subr.bf16.mxu1 %v806_v59 }
  0x85   : > { %871 = vmatprep.subr.bf16.mxu0 %v870_v62 }
  0x87   : > { %809 = vmatpush1.bf16.msra.mxu1 %v808_v1 }
  0x88   : > { %873 = vmatpush1.bf16.msra.mxu0 %v872_v2 }
  0x8a   : > { %488 = vmatmul.mubr.f32.vlgmr.msra.gmra.mrb[0].mxu1 %v291_v3 }
  0x8b   : > { %559 = vmatmul.mubr.f32.vlgmr.msra.gmra.mrb[0].mxu0 %v293_v4 }
 0x15d   : > { %v489_v5 = vpop.f32.mrb[0].mxu1 }
 0x15e   : > { %v560_v7 = vpop.f32.mrb[0].mxu0  ;;  %v491_v8 = vpop.f32.mrb[1].mxu1  ;;  %572 = sbr.rel (%p742_p6) target bundleno = 370 (0x172), region = 44 }
 0x15f   : > { %v561_v9 = vadd.f32 %v560_v7, %v489_v5  ;;  %v562_v11 = vpop.f32.mrb[1].mxu0 }
 0x160   : > { %v563_v12 = vadd.f32 %v562_v11, %v491_v8 }
 0x161   : > { %v565_v13 = vadd.f32 %v561_v9, %v289_v6 }
 0x162   : > { %v566_v14 = vadd.f32 %v563_v12, %v290_v10 }
 0x163   : > { %567 = vst [vmem:[%s1213_s12] sm:$0xff] %v565_v13 }
 0x164   : > { %568 = vst [vmem:[%s1213_s12 + $0x8] sm:$0xff] %v566_v14 }
 0x16a   : > { %v573_v20 = vld [vmem:[%s1213_s12] sm:$0xff] }
 0x16b   : > { %v574_v21 = vld [vmem:[%s1213_s12 + $0x8] sm:$0xff]  ;;  %v587_v24 = vadd.f32 %v580_v22, %v573_v20 }
 0x16c   : > { %v588_v25 = vadd.f32 %v584_v23, %v574_v21 }
 0x16d   : > { %vm589_vm0 = vcmp.ge.f32.partialorder %v587_v24, 0.0  ;;  %v591_v26 = vmul.f32 0.1, %v587_v24 }
 0x16e   : > { %vm590_vm1 = vcmp.ge.f32.partialorder %v588_v25, 0.0  ;;  %v592_v27 = vmul.f32 0.1, %v588_v25 }
 0x16f   : > { %v593_v28 = vsel %vm589_vm0, %v587_v24, %v591_v26 }
 0x170   : > { %v594_v29 = vsel %vm590_vm1, %v588_v25, %v592_v27  ;;  %595 = vst [vmem:[%s1213_s12] sm:$0xff] %v593_v28 }
 0x171   : > { %596 = vst [vmem:[%s1213_s12 + $0x8] sm:$0xff] %v594_v29 }
 0x172 PF: > { %s16_s19 = sadd.s32 1, %s1047_s19   ;;  %s1395_s12 = smov %s1023_s13 }
 0x173   : > { %p13_p8 = scmp.ge.s32.totalorder %s16_s19, 42   ;;  %s1396_s13 = smov %s1027_s14 }
 0x174   : > { %s1397_s14 = smov %s1141_s5  ;;  %s1398_s15 = smov %s1039_s17 }
 0x175   : > { %s1399_s16 = smov %s1043_s18  ;;  %s1400_s17 = smov %s1403_s21 }
 0x176   : > { %s1401_s18 = smov %s1407_s22  ;;  %15 = sbr.rel (!%p13_p8) target bundleno = 5 (0x5), region = 86 }
 0x17d   :  { %627 = vsyncpa [#allocation3], 1 }
 0x17e   :  { %629 = vsyncpa [#allocation3 + $0x1], 1 }

</bundles_post_ra>
